<compile_context>
chip_gen: v7x
topology: tpu7x:2x2x1
jax: 0.10.0
libtpu: 0.0.40
codegen_flags: <defaults>
</compile_context>

<pallas_src>
import functools

import jax
import jax.numpy as jnp
from jax.experimental import pallas as pl
from jax.experimental.pallas import tpu as pltpu

EPS = 1e-5       # nn.InstanceNorm2d default eps
LANE = 128       # TPU lane width


def _round_up(v, m):
    return (v + m - 1) // m * m


def _padded_vmem_bytes(shape, dtype):
    """Rough VMEM footprint of one block: last two dims padded to the native tile."""
    itemsize = jnp.dtype(dtype).itemsize
    sublane = {4: 8, 2: 16, 1: 32}[itemsize]
    lead = 1
    for d in shape[:-2]:
        lead *= int(d)
    return lead * _round_up(int(shape[-2]), sublane) * _round_up(int(shape[-1]), LANE) * itemsize


# ----------------------------------------------------------------------------
# Pallas kernel: im2col (in VMEM) -> one MXU matmul -> InstanceNorm -> ReLU
# ----------------------------------------------------------------------------
def _conv_in_relu_kernel(x_ref, w_ref, o_ref, col_ref, *, k, stride, ho, wo, cin):
    # x_ref:   (1, Hp, Wp, Cin)     bf16 zero-padded sample (resident across Cout tiles)
    # w_ref:   (k*k*Cin, CT)        bf16 weight tile for this Cout tile
    # o_ref:   (1, Ho*Wo, CT)       bf16 output tile (lane-dense CT)
    # col_ref: (Ho*Wo, k*k*Cin)     bf16 im2col slab, rebuilt only when Cout-tile index == 0
    cj = pl.program_id(1)

    @pl.when(cj == 0)
    def _build_im2col():
        pieces = []
        for kh in range(k):
            for kw in range(k):
                if stride == 1:
                    p = x_ref[0, pl.ds(kh, ho), pl.ds(kw, wo), :]
                else:
                    # TODO(synk): wrapper-side space-to-depth would make these slices dense.
                    p = x_ref[0, pl.ds(kh, ho, stride), pl.ds(kw, wo, stride), :]
                pieces.append(p)
        col = jnp.concatenate(pieces, axis=-1)                # (ho, wo, k*k*cin) bf16
        col_ref[...] = col.reshape(ho * wo, k * k * cin)       # single reshape + store

    # One MXU matmul, contraction depth K = k*k*Cin, f32 accumulation.
    conv = jnp.dot(col_ref[...], w_ref[...], preferred_element_type=jnp.float32)

    # InstanceNorm2d (affine=False): per-channel stats over this sample's H*W rows,
    # fused single pass (sum and sum-of-squares together), biased variance.
    inv_m = 1.0 / (ho * wo)
    s1 = jnp.sum(conv, axis=0, keepdims=True)
    s2 = jnp.sum(conv * conv, axis=0, keepdims=True)
    mean = s1 * inv_m
    var = jnp.maximum(s2 * inv_m - mean * mean, 0.0)
    y = (conv - mean) * jax.lax.rsqrt(var + EPS)
    # ReLU + bf16 store (stats/normalize stayed f32).
    o_ref[0] = jnp.maximum(y, 0.0).astype(o_ref.dtype)


# ----------------------------------------------------------------------------
# Wrapper: layout plumbing + pallas_call (NCHW in, NCHW out by default)
# ----------------------------------------------------------------------------
def conv_block_forward(x_nchw, weight_oihw, bias, *, stride=1, padding=1, nchw_out=True):
    """Fused Conv2d(+bias) -> InstanceNorm2d -> ReLU.

    NCHW input (PyTorch layout).  nchw_out=False returns NHWC bf16 and skips the final
    transpose (preferred when the consumer is another ConvBlock).
    """
    # Conv bias is intentionally NOT applied: InstanceNorm (affine=False) subtracts the
    # per-(sample, channel) spatial mean, which exactly cancels a per-channel constant.
    # Valid only for the default InstanceNorm path (see TODO at top).
    del bias

    n, cin, h, w = x_nchw.shape
    cout, cin_w, kh_, kw_ = weight_oihw.shape
    assert cin == cin_w and kh_ == kw_, (x_nchw.shape, weight_oihw.shape)
    k = kh_
    ho = (h + 2 * padding - k) // stride + 1
    wo = (w + 2 * padding - k) // stride + 1
    m = ho * wo
    kkc = k * k * cin
    cout_p = _round_up(cout, LANE)                       # lane-dense output channels
    ct = 256 if cout_p % 256 == 0 else LANE              # 128-256 lanes per Cout tile
    ct = min(ct, cout_p)
    n_ct = cout_p // ct

    # NCHW -> NHWC, bf16 for the MXU, spatial zero-pad.  Under jit these fuse into one
    # HBM pass; chained ConvBlocks should keep activations NHWC/bf16 (nchw_out=False).
    x = jnp.transpose(x_nchw, (0, 2, 3, 1)).astype(jnp.bfloat16)
    xp = jnp.pad(x, ((0, 0), (padding, padding), (padding, padding), (0, 0)))
    hp, wp = h + 2 * padding, w + 2 * padding

    # (Cout, Cin, k, k) -> (k*k*Cin, Cout_p): row index (kh*k + kw)*Cin + ci matches the
    # in-kernel im2col column order; channel columns zero-padded to a lane multiple.
    wm = jnp.transpose(weight_oihw, (2, 3, 1, 0)).reshape(kkc, cout)
    wm = jnp.pad(wm, ((0, 0), (0, cout_p - cout))).astype(jnp.bfloat16)

    kernel = functools.partial(_conv_in_relu_kernel, k=k, stride=stride,
                               ho=ho, wo=wo, cin=cin)

    # VMEM budget from actual block sizes: double-buffered in/out blocks + weight tile +
    # im2col scratch + in-flight f32 conv tile, with headroom, capped by physical VMEM.
    need = (2 * _padded_vmem_bytes((1, hp, wp, cin), jnp.bfloat16)
            + 2 * _padded_vmem_bytes((kkc, ct), jnp.bfloat16)
            + 2 * _padded_vmem_bytes((1, m, ct), jnp.bfloat16)
            + _padded_vmem_bytes((m, kkc), jnp.bfloat16)
            + _padded_vmem_bytes((m, ct), jnp.float32))
    try:
        vmem_cap = int(pltpu.get_tpu_info().vmem_capacity_bytes)
    except Exception:
        vmem_cap = 64 * 1024 * 1024                      # conservative (v7x per-core VMEM)
    vmem_limit = int(min(max(2 * need + (8 << 20), 32 << 20), vmem_cap * 7 // 8))

    flops = int(2 * n * m * kkc * cout_p)
    bytes_accessed = int(xp.size * 2 + n * wm.size * 2 + n * m * cout_p * 2)

    out = pl.pallas_call(
        kernel,
        out_shape=jax.ShapeDtypeStruct((n, m, cout_p), jnp.bfloat16),
        grid_spec=pltpu.PrefetchScalarGridSpec(
            num_scalar_prefetch=0,
            grid=(n, n_ct),   # (sample, Cout tile); Cout tiling is exact for InstanceNorm
            in_specs=[
                # full padded sample; index_map ignores j -> stays resident across Cout tiles
                pl.BlockSpec((1, hp, wp, cin), lambda i, j: (i, 0, 0, 0)),
                # weight tile for the j-th Cout tile
                pl.BlockSpec((kkc, ct), lambda i, j: (0, j)),
            ],
            out_specs=pl.BlockSpec((1, m, ct), lambda i, j: (i, 0, j)),
            scratch_shapes=[pltpu.VMEM((m, kkc), jnp.bfloat16)],   # cached im2col slab
        ),
        compiler_params=pltpu.CompilerParams(
            # Batch axis is fully independent (per-sample stats) -> megacore-shardable.
            # The Cout axis must stay "arbitrary": it reuses the im2col built at j == 0.
            dimension_semantics=("parallel", "arbitrary"),
            vmem_limit_bytes=vmem_limit,
        ),
        cost_estimate=pl.CostEstimate(
            flops=flops, transcendentals=0, bytes_accessed=bytes_accessed),
    )(xp, wm)

    out = out.reshape(n, ho, wo, cout_p)[..., :cout]      # drop padded channels
    if nchw_out:
        out = jnp.transpose(out, (0, 3, 1, 2))            # back to PyTorch NCHW
    return out


# ----------------------------------------------------------------------------
# Pure-JAX reference (with bias, f32) for correctness checking
# ----------------------------------------------------------------------------
def _reference(x_nchw, weight_oihw, bias, stride, padding):
    y = jax.lax.conv_general_dilated(
        x_nchw, weight_oihw,
        window_strides=(stride, stride),
        padding=[(padding, padding), (padding, padding)],
        dimension_numbers=("NCHW", "OIHW", "NCHW"))
    y = y + bias[None, :, None, None]
    mean = jnp.mean(y, axis=(2, 3), keepdims=True)
    var = jnp.mean(jnp.square(y - mean), axis=(2, 3), keepdims=True)
    y = (y - mean) * jax.lax.rsqrt(var + EPS)
    return jnp.maximum(y, 0.0)


# ----------------------------------------------------------------------------
# Demo
# ----------------------------------------------------------------------------
if __name__ == "__main__":
    key = jax.random.PRNGKey(0)
    k_x, k_w, k_b = jax.random.split(key, 3)

    batch, in_channels, out_channels, hw = 2, 4, 64, 16
    ksize, stride, padding = 3, 1, 1

    x = jax.random.normal(k_x, (batch, in_channels, hw, hw), dtype=jnp.float32)
    bound = 1.0 / (in_channels * ksize * ksize) ** 0.5
    weight = jax.random.uniform(k_w, (out_channels, in_channels, ksize, ksize),
                                jnp.float32, -bound, bound)
    bias = jax.random.uniform(k_b, (out_channels,), jnp.float32, -bound, bound)

    fwd = jax.jit(functools.partial(conv_block_forward, stride=stride, padding=padding))
    out = jax.block_until_ready(fwd(x, weight, bias))

    assert out.shape == (batch, out_channels, hw, hw), out.shape
    out_f32 = out.astype(jnp.float32)
    assert bool(jnp.all(jnp.isfinite(out_f32)))

    ref = _reference(x, weight, bias, stride, padding)
    # bf16 conv inputs + bf16 output vs. a full-f32 reference; tolerance documents that.
    max_err = float(jnp.max(jnp.abs(out_f32 - ref)))
    assert max_err < 5e-2, f"max abs error {max_err}"

    print("KERNEL_OK")
</pallas_src>

<mosaic_0001>
module attributes {stable_mosaic.version = 11 : i64} {
  func.func @_conv_in_relu_kernel(%arg0: i32, %arg1: i32, %arg2: memref<1x18x18x4xbf16, #tpu.memory_space<vmem>>, %arg3: memref<36x128xbf16, #tpu.memory_space<vmem>>, %arg4: memref<1x256x128xbf16, #tpu.memory_space<vmem>>, %arg5: memref<256x36xbf16, #tpu.memory_space<vmem>>) attributes {dimension_semantics = [#tpu.dimension_semantics<parallel>, #tpu.dimension_semantics<arbitrary>], iteration_bounds = array<i64: 2, 1>, scalar_prefetch = 0 : i64, scratch_operands = 1 : i64, tpu.core_type = #tpu.core_type<tc>, window_params = [{transform_indices = @transform_0, window_bounds = array<i64: 1, 18, 18, 4>}, {transform_indices = @transform_1, window_bounds = array<i64: 36, 128>}, {transform_indices = @transform_2, window_bounds = array<i64: 1, 256, 128>}]} {
    %c0_i32 = arith.constant 0 : i32
    %0 = arith.cmpi eq, %arg1, %c0_i32 : i32
    %1 = arith.extui %0 : i1 to i32
    %c0_i32_0 = arith.constant 0 : i32
    %2 = arith.cmpi ne, %1, %c0_i32_0 : i32
    scf.if %2 {
      %c0_14 = arith.constant 0 : index
      %c0_15 = arith.constant 0 : index
      %c0_16 = arith.constant 0 : index
      %c0_17 = arith.constant 0 : index
      %32 = vector.load %arg2[%c0_14, %c0_15, %c0_16, %c0_17] : memref<1x18x18x4xbf16, #tpu.memory_space<vmem>>, vector<1x16x16x4xbf16>
      %33 = vector.shape_cast %32 : vector<1x16x16x4xbf16> to vector<16x16x4xbf16>
      %c0_18 = arith.constant 0 : index
      %c0_19 = arith.constant 0 : index
      %c1 = arith.constant 1 : index
      %c0_20 = arith.constant 0 : index
      %34 = vector.load %arg2[%c0_18, %c0_19, %c1, %c0_20] : memref<1x18x18x4xbf16, #tpu.memory_space<vmem>>, vector<1x16x16x4xbf16>
      %35 = vector.shape_cast %34 : vector<1x16x16x4xbf16> to vector<16x16x4xbf16>
      %c0_21 = arith.constant 0 : index
      %c0_22 = arith.constant 0 : index
      %c2 = arith.constant 2 : index
      %c0_23 = arith.constant 0 : index
      %36 = vector.load %arg2[%c0_21, %c0_22, %c2, %c0_23] : memref<1x18x18x4xbf16, #tpu.memory_space<vmem>>, vector<1x16x16x4xbf16>
      %37 = vector.shape_cast %36 : vector<1x16x16x4xbf16> to vector<16x16x4xbf16>
      %c0_24 = arith.constant 0 : index
      %c1_25 = arith.constant 1 : index
      %c0_26 = arith.constant 0 : index
      %c0_27 = arith.constant 0 : index
      %38 = vector.load %arg2[%c0_24, %c1_25, %c0_26, %c0_27] : memref<1x18x18x4xbf16, #tpu.memory_space<vmem>>, vector<1x16x16x4xbf16>
      %39 = vector.shape_cast %38 : vector<1x16x16x4xbf16> to vector<16x16x4xbf16>
      %c0_28 = arith.constant 0 : index
      %c1_29 = arith.constant 1 : index
      %c1_30 = arith.constant 1 : index
      %c0_31 = arith.constant 0 : index
      %40 = vector.load %arg2[%c0_28, %c1_29, %c1_30, %c0_31] : memref<1x18x18x4xbf16, #tpu.memory_space<vmem>>, vector<1x16x16x4xbf16>
      %41 = vector.shape_cast %40 : vector<1x16x16x4xbf16> to vector<16x16x4xbf16>
      %c0_32 = arith.constant 0 : index
      %c1_33 = arith.constant 1 : index
      %c2_34 = arith.constant 2 : index
      %c0_35 = arith.constant 0 : index
      %42 = vector.load %arg2[%c0_32, %c1_33, %c2_34, %c0_35] : memref<1x18x18x4xbf16, #tpu.memory_space<vmem>>, vector<1x16x16x4xbf16>
      %43 = vector.shape_cast %42 : vector<1x16x16x4xbf16> to vector<16x16x4xbf16>
      %c0_36 = arith.constant 0 : index
      %c2_37 = arith.constant 2 : index
      %c0_38 = arith.constant 0 : index
      %c0_39 = arith.constant 0 : index
      %44 = vector.load %arg2[%c0_36, %c2_37, %c0_38, %c0_39] : memref<1x18x18x4xbf16, #tpu.memory_space<vmem>>, vector<1x16x16x4xbf16>
      %45 = vector.shape_cast %44 : vector<1x16x16x4xbf16> to vector<16x16x4xbf16>
      %c0_40 = arith.constant 0 : index
      %c2_41 = arith.constant 2 : index
      %c1_42 = arith.constant 1 : index
      %c0_43 = arith.constant 0 : index
      %46 = vector.load %arg2[%c0_40, %c2_41, %c1_42, %c0_43] : memref<1x18x18x4xbf16, #tpu.memory_space<vmem>>, vector<1x16x16x4xbf16>
      %47 = vector.shape_cast %46 : vector<1x16x16x4xbf16> to vector<16x16x4xbf16>
      %c0_44 = arith.constant 0 : index
      %c2_45 = arith.constant 2 : index
      %c2_46 = arith.constant 2 : index
      %c0_47 = arith.constant 0 : index
      %48 = vector.load %arg2[%c0_44, %c2_45, %c2_46, %c0_47] : memref<1x18x18x4xbf16, #tpu.memory_space<vmem>>, vector<1x16x16x4xbf16>
      %49 = vector.shape_cast %48 : vector<1x16x16x4xbf16> to vector<16x16x4xbf16>
      %50 = tpu.concatenate %33, %35, %37, %39, %41, %43, %45, %47, %49 in 2 : vector<16x16x4xbf16>, vector<16x16x4xbf16>, vector<16x16x4xbf16>, vector<16x16x4xbf16>, vector<16x16x4xbf16>, vector<16x16x4xbf16>, vector<16x16x4xbf16>, vector<16x16x4xbf16>, vector<16x16x4xbf16> -> vector<16x16x36xbf16>
      %51 = vector.shape_cast %50 : vector<16x16x36xbf16> to vector<256x36xbf16>
      %c0_48 = arith.constant 0 : index
      %c0_49 = arith.constant 0 : index
      %52 = vector.load %arg5[%c0_48, %c0_49] : memref<256x36xbf16, #tpu.memory_space<vmem>>, vector<256x36xbf16>
      tpu.vector_store %arg5[%c0_48, %c0_49], %51 {strides = array<i32>} : memref<256x36xbf16, #tpu.memory_space<vmem>>, vector<256x36xbf16>,
    } else {
    }
    %c0 = arith.constant 0 : index
    %c0_1 = arith.constant 0 : index
    %3 = vector.load %arg5[%c0, %c0_1] : memref<256x36xbf16, #tpu.memory_space<vmem>>, vector<256x36xbf16>
    %c0_2 = arith.constant 0 : index
    %c0_3 = arith.constant 0 : index
    %4 = vector.load %arg3[%c0_2, %c0_3] : memref<36x128xbf16, #tpu.memory_space<vmem>>, vector<36x128xbf16>
    %cst = arith.constant dense<0.000000e+00> : vector<256x128xf32>
    %5 = tpu.matmul %3, %4, %cst {dimension_numbers = #tpu.dot_dimension_numbers<[1], [0], [0], [1], [0, 0, 1, 1], [], []>} : vector<256x36xbf16>, vector<36x128xbf16>, vector<256x128xf32> -> vector<256x128xf32>
    %cst_4 = arith.constant dense<0.000000e+00> : vector<128xf32>
    %6 = vector.multi_reduction <add>, %5, %cst_4 [0] : vector<256x128xf32> to vector<128xf32>
    %7 = vector.shape_cast %6 : vector<128xf32> to vector<1x128xf32>
    %8 = arith.mulf %5, %5 : vector<256x128xf32>
    %cst_5 = arith.constant dense<0.000000e+00> : vector<128xf32>
    %9 = vector.multi_reduction <add>, %8, %cst_5 [0] : vector<256x128xf32> to vector<128xf32>
    %10 = vector.shape_cast %9 : vector<128xf32> to vector<1x128xf32>
    %cst_6 = arith.constant 3.906250e-03 : f32
    %11 = vector.broadcast %cst_6 : f32 to vector<1x128xf32>
    %12 = arith.mulf %7, %11 : vector<1x128xf32>
    %cst_7 = arith.constant 3.906250e-03 : f32
    %13 = vector.broadcast %cst_7 : f32 to vector<1x128xf32>
    %14 = arith.mulf %10, %13 : vector<1x128xf32>
    %15 = arith.mulf %12, %12 : vector<1x128xf32>
    %16 = arith.subf %14, %15 : vector<1x128xf32>
    %cst_8 = arith.constant 0.000000e+00 : f32
    %17 = vector.broadcast %cst_8 : f32 to vector<1x128xf32>
    %18 = arith.maximumf %16, %17 : vector<1x128xf32>
    %19 = vector.broadcast %12 : vector<1x128xf32> to vector<256x128xf32>
    %20 = arith.subf %5, %19 : vector<256x128xf32>
    %cst_9 = arith.constant 9.99999974E-6 : f32
    %21 = vector.broadcast %cst_9 : f32 to vector<1x128xf32>
    %22 = arith.addf %18, %21 : vector<1x128xf32>
    %23 = math.rsqrt %22 : vector<1x128xf32>
    %24 = vector.broadcast %23 : vector<1x128xf32> to vector<256x128xf32>
    %25 = arith.mulf %20, %24 : vector<256x128xf32>
    %cst_10 = arith.constant 0.000000e+00 : f32
    %26 = vector.broadcast %cst_10 : f32 to vector<256x128xf32>
    %27 = arith.maximumf %25, %26 : vector<256x128xf32>
    %28 = arith.truncf %27 : vector<256x128xf32> to vector<256x128xbf16>
    %c0_11 = arith.constant 0 : index
    %c0_12 = arith.constant 0 : index
    %c0_13 = arith.constant 0 : index
    %29 = vector.load %arg4[%c0_11, %c0_12, %c0_13] : memref<1x256x128xbf16, #tpu.memory_space<vmem>>, vector<1x256x128xbf16>
    %30 = vector.shape_cast %29 : vector<1x256x128xbf16> to vector<256x128xbf16>
    %31 = vector.shape_cast %28 : vector<256x128xbf16> to vector<1x256x128xbf16>
    tpu.vector_store %arg4[%c0_11, %c0_12, %c0_13], %31 {strides = array<i32>} : memref<1x256x128xbf16, #tpu.memory_space<vmem>>, vector<1x256x128xbf16>,
    return
  }
  func.func @transform_0(%arg0: i32, %arg1: i32) -> (i32, i32, i32, i32) {
    %c0_i32 = arith.constant 0 : i32
    %c0_i32_0 = arith.constant 0 : i32
    %c0_i32_1 = arith.constant 0 : i32
    %c0_i32_2 = arith.constant 0 : i32
    return %arg0, %c0_i32, %c0_i32_0, %c0_i32_1 : i32, i32, i32, i32
  }
  func.func @transform_1(%arg0: i32, %arg1: i32) -> (i32, i32) {
    %c0_i32 = arith.constant 0 : i32
    %c0_i32_0 = arith.constant 0 : i32
    return %c0_i32, %arg1 : i32, i32
  }
  func.func @transform_2(%arg0: i32, %arg1: i32) -> (i32, i32, i32) {
    %c0_i32 = arith.constant 0 : i32
    %c0_i32_0 = arith.constant 0 : i32
    return %arg0, %c0_i32, %arg1 : i32, i32, i32
  }
}

</mosaic_0001>

<bundles_post_ra>
// kernel: conv_block_forward.1
= control target key start
LH: loop header
LB: loop body
LE: loop exit
PB: predicated region body
PF: predicated region fallthrough
CT: control target
= control target key end

     0   :  { %s3647_s9 = smov 0   ;;  %s3649_s10 = smov 0   ;;  %s5038_s0 = inlined_call_operand.vmem [shape: bf16[2,18,18,4], index: 0, kind: input, shape index: {}]   ;;  %s5039_s1 = inlined_call_operand.vmem [shape: bf16[36,128], index: 1, kind: input, shape index: {}]   ;;  %s5040_s2 = inlined_call_operand.vmem [shape: bf16[2,256,128], index: 2, kind: output, shape index: {}]  }
   0x1   :  { %s3651_s11 = smov 0  }
   0x2 LB: > { %s24_s12 = sadd.s32 1, %s3618_s10  ;;  %p2900_p0 = scmp.ge.s32.totalorder %s3622_s11, 1  ;;  %s3622_s11 = sphi %s3651_s11, %s12_s11   ;;  %s3618_s10 = sphi %s3649_s10, %s5042_s10   ;;  %s3614_s9 = sphi %s3647_s9, %s5041_s9  }
   0x3   : > { %p26_p1 = scmp.ge.s32.totalorder %s24_s12, 2  ;;  %p135_p2 = scmp.lt.s32.totalorder %s3622_s11, 3 }
   0x5   : > { %s5044_s12 = smov (%p26_p1, %s24_s12), 0  ;;  %p136_p3 = pnand %p2900_p0, %p135_p2 }
   0x6   : > { %p164_p4 = scmp.lt.s32.totalorder (!%p136_p3), %s3614_s9, 1  ;;  %vm781_vm0 = vcmask (!%p136_p3), 1046528   ;;  %s3624_s17 = smov (!%p136_p3), 12   ;;  %vm508_vm1 = vsmask.f32 (!%p136_p3), 7424  ;;  %vm2268_vm2 = vcmask (!%p136_p3), 1041408  }
   0x7   : > { %139 = sbr.rel (%p136_p3) target bundleno = 685 (0x2ad), region = 28  ;;  %s3625_s18 = smov (!%p136_p3), 20   ;;  %vm1886_vm3 = vcmask (!%p136_p3), 31744   ;;  %vm1919_vm4 = vcmask (!%p136_p3), 64512   ;;  %vm1952_vm5 = vcmask (!%p136_p3), 97280   ;;  %vm1985_vm6 = vcmask (!%p136_p3), 130048  }
   0x8   : > { %s3626_s19 = smov (!%p136_p3), 8   ;;  %s3627_s20 = smov (!%p136_p3), 4   ;;  %vm2018_vm7 = vcmask (!%p136_p3), 162816   ;;  %vm2051_vm8 = vcmask (!%p136_p3), 195584   ;;  %vm2084_vm9 = vcmask (!%p136_p3), 228352   ;;  %vm2117_vm10 = vcmask (!%p136_p3), 261120  }
   0x9   : > { %s3628_s23 = smov (!%p136_p3), 16   ;;  %s3629_s26 = smov (!%p136_p3), 24   ;;  %vm2166_vm11 = vcmask (!%p136_p3), 293888  }
   0xa   : > { %s3630_s27 = smov (!%p136_p3), 28   ;;  %s3631_s28 = smov (!%p136_p3), 32  }
   0xe   : > { %s5046_s9 = smov (!%p164_p4, %s3614_s9), 1 }
   0xf   : > { %s3422_s13 = smul.u32 216, %s5046_s9  ;;  %s3229_s3 = sshll.u32 %s5046_s9, 7 }
  0x10   : > { %s5011_s6 = scalar_lea.vmem %s5040_s2, %s3229_s3 }
  0x11   : > { %s3671_s16 = scalar_lea.vmem %s5038_s0, %s3422_s13 }
  0x12   : > { %v2906_v0 = vld [vmem:[%s3671_s16 + $0x18] sm:$0xf]  ;;  %v2907_v1 = vld [vmem:[%s3671_s16 + $0x1c] sm:$0xf]  ;;  %v2904_v5 = vld [vmem:[%s3671_s16 + $0xc] sm:$0xf] }
  0x13   : > { %v2953_v2 = vld [vmem:[%s3671_s16 + $0x18] sm:$0xe]  ;;  %v3676_v3 = vcombine.low %v2906_v0, %v2907_v1  ;;  %v2905_v6 = vld [vmem:[%s3671_s16 + $0x10] sm:$0xf]  ;;  %v2952_v7 = vld [vmem:[%s3671_s16 + $0xc] sm:$0xe] }
  0x14   : > { %v3113_v4 = vcombine.low %v2953_v2, %v2907_v1  ;;  %v3681_v8 = vcombine.low %v2904_v5, %v2905_v6  ;;  %v3112_v9 = vcombine.low %v2952_v7, %v2905_v6  ;;  %v3684_v10 = vld [vmem:[%s3671_s16 + $0x14] ss:$0 sps:$4 sm:$0x11]   ;;  %v187_v12 = vld [vmem:[%s3671_s16 + $0x4] sm:$0xf] }
  0x15   : > { %944 = vrot.lane.b32.xlu1 %v3676_v3, %s3624_s17  ;;  %v1037_v11 = vshll.u32 %v3676_v3, 16  ;;  %v1295_v15 = vrot.slane %v3684_v10, 1  ;;  %v234_v16 = vld [vmem:[%s3671_s16] sm:$0xe]  ;;  %v1035_v21 = vshrl.u32 %v3676_v3, 16  ;;  %v1030_v59 = vshll.u32 %v3684_v10, 16 }
  0x16   : > { %942 = vrot.lane.b32.xlu0 %v3681_v8, %s3624_s17  ;;  %v1025_v13 = vshll.u32 %v3681_v8, 16  ;;  %v1294_v14 = vrot.slane %v3112_v9, 1  ;;  %v1297_v17 = vrot.slane %v3113_v4, 1  ;;  %v3460_v18 = vld [vmem:[%s3671_s16 + $0x8] ss:$0 sps:$4 sm:$0x11]   ;;  %v3064_v19 = vcombine.low %v234_v16, %v187_v12 }
  0x17   : > { %v186_v20 = vld [vmem:[%s3671_s16] sm:$0xf]  ;;  %v188_v24 = vld [vmem:[%s3671_s16 + $0xc] sm:$0xf]  ;;  %v189_v25 = vld [vmem:[%s3671_s16 + $0x10] sm:$0xf] }
  0x18   : > { %v1296_v22 = vsel %vm781_vm0, %v1294_v14, %v1295_v15  ;;  %v3699_v23 = vcombine.low %v186_v20, %v187_v12  ;;  %v782_v26 = vrot.slane %v3064_v19, 1  ;;  %v783_v27 = vrot.slane %v3460_v18, 1  ;;  %v235_v28 = vld [vmem:[%s3671_s16 + $0xc] sm:$0xe]  ;;  %v2970_v43 = vld [vmem:[%s3671_s16 + $0x24] sm:$0xf] }
  0x19   : > { %v3704_v29 = vcombine.low %v188_v24, %v189_v25  ;;  %v517_v30 = vshll.u32 %v3460_v18, 16  ;;  %v3464_v31 = vld [vmem:[%s3671_s16 + $0x14] ss:$0 sps:$4 sm:$0x11]   ;;  %v3065_v32 = vcombine.low %v235_v28, %v189_v25  ;;  %v1039_v35 = vrot.slane %v1037_v11, 1 }
  0x1a   : > { %1342 = vrot.lane.b32.xlu0 %v1296_v22, %s3625_s18  ;;  %v510_v33 = vshrl.u32 %v3699_v23, 16  ;;  %v512_v34 = vshll.u32 %v3699_v23, 16  ;;  %v784_v36 = vsel %vm781_vm0, %v782_v26, %v783_v27  ;;  %v3466_v38 = vld [vmem:[%s3671_s16 + $0x20] ss:$0 sps:$4 sm:$0x11]   ;;  %v786_v40 = vrot.slane %v3464_v31, 1 }
  0x1b   : > { %v519_v37 = vrot.slane %v517_v30, 1  ;;  %830 = vrot.lane.b32.xlu1 %v784_v36, %s3626_s19  ;;  %v785_v39 = vrot.slane %v3065_v32, 1  ;;  %v522_v42 = vshrl.u32 %v3704_v29, 16  ;;  %v1298_v44 = vrot.slane %v3466_v38, 1  ;;  %v3717_v48 = vld [vmem:[%s3671_s16 + $0x28] sm:$0xf] }
  0x1c   : > { %v514_v41 = vrot.slane %v512_v34, 1  ;;  %v524_v45 = vshll.u32 %v3704_v29, 16  ;;  %v529_v46 = vshll.u32 %v3464_v31, 16  ;;  %v1042_v47 = vshll.u32 %v3466_v38, 16  ;;  %v2968_v53 = vld [vmem:[%s3671_s16 + $0x18] sm:$0xf] }
  0x1d   : > { %v787_v49 = vsel %vm781_vm0, %v785_v39, %v786_v40  ;;  %v1023_v51 = vshrl.u32 %v3681_v8, 16  ;;  %v1027_v52 = vrot.slane %v1025_v13, 1  ;;  %v2969_v56 = vld [vmem:[%s3671_s16 + $0x1c] sm:$0xf]  ;;  %v1040_v58 = vor.u32 %v1039_v35, %v1035_v21  ;;  %v3016_v7 = vld [vmem:[%s3671_s16 + $0x18] sm:$0xe] }
  0x1e   : > { %v515_v50 = vor.u32 %v514_v41, %v510_v33  ;;  %v526_v54 = vrot.slane %v524_v45, 1  ;;  %v531_v55 = vrot.slane %v529_v46, 1  ;;  %v3129_v60 = vcombine.low %v2970_v43, %v3717_v48  ;;  %v3730_v1 = vld [vmem:[%s3671_s16 + $0x2c] ss:$0 sps:$4 sm:$0x11]   ;;  %v3539_v26 = vld [vmem:[%s5039_s1] sm:$0xff]  }
  0x1f   : > { %832 = vrot.lane.b32.xlu1 %v787_v49, %s3626_s19  ;;  %v1299_v61 = vsel %vm781_vm0, %v1297_v17, %v1298_v44  ;;  %v1044_v63 = vrot.slane %v1042_v47, 1  ;;  %v3128_v0 = vcombine.low %v2968_v53, %v2969_v56  ;;  %v1028_v2 = vor.u32 %v1027_v52, %v1023_v51  ;;  %v3733_v5 = vld [vmem:[%s3671_s16 + $0x20] ss:$0 sps:$4 sm:$0x11]   ;;  %v190_v10 = vld [vmem:[%s3671_s16 + $0x18] sm:$0xf]  ;;  %3376 = vmatprep.subr.bf16.mxu0 %v3539_v26 }
  0x20   : > { %v520_v57 = vsel %vm508_vm1, %v515_v50, %v519_v37  ;;  %v527_v62 = vor.u32 %v526_v54, %v522_v42  ;;  %v1032_v3 = vrot.slane %v1030_v59, 1  ;;  %v1549_v4 = vshll.u32 %v3129_v60, 16  ;;  %v3741_v13 = vld [vmem:[%s3671_s16 + $0x1c] sm:$0xf]  ;;  %v192_v21 = vld [vmem:[%s3671_s16 + $0x24] sm:$0xf]  ;;  %3377 = vmatpush3.bf16.msra.mxu0 %v3539_v26  ;;  %3414 = vmatprep.subr.bf16.mxu1 %v3539_v26 }
  0x21   : > { %701 = vrot.lane.b32.xlu0 %v520_v57, %s3627_s20  ;;  %v1537_v8 = vshll.u32 %v3128_v0, 16  ;;  %v1547_v9 = vshrl.u32 %v3129_v60, 16  ;;  %v1554_v12 = vshll.u32 %v3730_v1, 16  ;;  %v1045_v14 = vsel %vm508_vm1, %v1040_v58, %v1044_v63  ;;  %v3749_v17 = vld [vmem:[%s3671_s16 + $0x20] ss:$0 sps:$4 sm:$0x11]   ;;  %3417 = vmatpush3.bf16.msra.mxu1 %v3539_v26 }
  0x22   : > { %v532_v6 = vsel %vm508_vm1, %v527_v62, %v531_v55  ;;  %v1551_v11 = vrot.slane %v1549_v4, 1  ;;  %v1535_v15 = vshrl.u32 %v3128_v0, 16  ;;  %v3746_v16 = vcombine.low %v190_v10, %v3741_v13  ;;  %v3755_v22 = vld [vmem:[%s3671_s16 + $0x28] sm:$0xf]  ;;  %v3017_v38 = vld [vmem:[%s3671_s16 + $0x24] sm:$0xe] }
  0x23   : > { %1344 = vrot.lane.b32.xlu1 %v1299_v61, %s3625_s18  ;;  %v1033_v18 = vsel %vm508_vm1, %v1028_v2, %v1032_v3  ;;  %v1539_v19 = vrot.slane %v1537_v8, 1  ;;  %v1542_v20 = vshll.u32 %v3733_v5, 16  ;;  %v3160_v24 = vcombine.low %v3016_v7, %v2969_v56  ;;  %v3769_v34 = vld [vmem:[%s3671_s16 + $0x2c] ss:$0 sps:$4 sm:$0x11]  }
  0x24   : > { %v536_v25 = vshll.u32 %v3746_v16, 16  ;;  %v1552_v27 = vor.u32 %v1551_v11, %v1547_v9  ;;  %v1556_v28 = vrot.slane %v1554_v12, 1  ;;  %v541_v30 = vshll.u32 %v3749_v17, 16  ;;  %v3540_v39 = vld [vmem:[%s5039_s1 + $0x8] sm:$0xff]   ;;  %v237_v44 = vld [vmem:[%s3671_s16 + $0x24] sm:$0xe] }
  0x25   : > { %703 = vrot.lane.b32.xlu0 %v532_v6, %s3627_s20  ;;  %v3764_v31 = vcombine.low %v192_v21, %v3755_v22  ;;  %v534_v32 = vshrl.u32 %v3746_v16, 16  ;;  %v1540_v35 = vor.u32 %v1539_v19, %v1535_v15  ;;  %v1544_v36 = vrot.slane %v1542_v20, 1  ;;  %v236_v50 = vld [vmem:[%s3671_s16 + $0x18] sm:$0xe]  ;;  %3378 = vmatprep.subr.bf16.mxu0 %v3540_v39  ;;  %v2910_v53 = vld [vmem:[%s3671_s16 + $0x30] sm:$0xf] }
  0x26   : > { %v538_v33 = vrot.slane %v536_v25, 1  ;;  %v1557_v40 = vsel %vm508_vm1, %v1552_v27, %v1556_v28  ;;  %v543_v41 = vrot.slane %v541_v30, 1  ;;  %v1806_v42 = vrot.slane %v3160_v24, 1  ;;  %v2911_v54 = vld [vmem:[%s3671_s16 + $0x34] sm:$0xf]  ;;  %3379 = vmatpush3.bf16.msra.mxu0 %v3540_v39  ;;  %3415 = vmatprep.subr.bf16.mxu1 %v3540_v39 }
  0x27   : > { %1216 = vrot.lane.b32.xlu1 %v1045_v14, %s3628_s23  ;;  %v548_v37 = vshll.u32 %v3764_v31, 16  ;;  %v1807_v43 = vrot.slane %v3733_v5, 1  ;;  %v546_v46 = vshrl.u32 %v3764_v31, 16  ;;  %v553_v49 = vshll.u32 %v3769_v34, 16  ;;  %v2908_v55 = vld [vmem:[%s3671_s16 + $0x24] sm:$0xf]  ;;  %3418 = vmatpush3.bf16.msra.mxu1 %v3540_v39 }
  0x28   : > { %v539_v45 = vor.u32 %v538_v33, %v534_v32  ;;  %v3161_v51 = vcombine.low %v3017_v38, %v3717_v48  ;;  %v1545_v52 = vsel %vm508_vm1, %v1540_v35, %v1544_v36  ;;  %v2909_v56 = vld [vmem:[%s3671_s16 + $0x28] sm:$0xf]  ;;  %v3067_v58 = vcombine.low %v237_v44, %v3755_v22  ;;  %v3799_v3 = vld [vmem:[%s3671_s16 + $0x38] ss:$0 sps:$4 sm:$0x11]  }
  0x29   : > { %1214 = vrot.lane.b32.xlu0 %v1033_v18, %s3628_s23  ;;  %v550_v47 = vrot.slane %v548_v37, 1  ;;  %v1808_v57 = vsel %vm781_vm0, %v1806_v42, %v1807_v43  ;;  %v3083_v61 = vcombine.low %v2910_v53, %v2911_v54  ;;  %v1810_v63 = vrot.slane %v3730_v1, 1  ;;  %v3484_v11 = vld [vmem:[%s3671_s16 + $0x2c] ss:$0 sps:$4 sm:$0x11]  }
  0x2a   : > { %v544_v48 = vsel %vm508_vm1, %v539_v45, %v543_v41  ;;  %v1809_v62 = vrot.slane %v3161_v51, 1  ;;  %v3082_v2 = vcombine.low %v2908_v55, %v2909_v56  ;;  %v791_v5 = vrot.slane %v3067_v58, 1  ;;  %v2955_v12 = vld [vmem:[%s3671_s16 + $0x30] sm:$0xe]  ;;  %v2974_v21 = vld [vmem:[%s3671_s16 + $0x3c] sm:$0xf] }
  0x2b   : > { %1456 = vrot.lane.b32.xlu1 %v3129_v60, %s3629_s26  ;;  %v551_v59 = vor.u32 %v550_v47, %v546_v46  ;;  %v555_v60 = vrot.slane %v553_v49, 1  ;;  %v792_v6 = vrot.slane %v3769_v34, 1  ;;  %v1061_v7 = vshll.u32 %v3083_v61, 16  ;;  %v3815_v22 = vld [vmem:[%s3671_s16 + $0x40] sm:$0xf] }
  0x2c   : > { %v1811_v1 = vsel %vm781_vm0, %v1809_v62, %v1810_v63  ;;  %v789_v9 = vrot.slane %v3749_v17, 1  ;;  %v1049_v10 = vshll.u32 %v3082_v2, 16  ;;  %v1059_v14 = vshrl.u32 %v3083_v61, 16  ;;  %v2972_v26 = vld [vmem:[%s3671_s16 + $0x30] sm:$0xf] }
  0x2d   : > { %1454 = vrot.lane.b32.xlu0 %v3128_v0, %s3629_s26  ;;  %v3066_v0 = vcombine.low %v236_v50, %v3741_v13  ;;  %v556_v4 = vsel %vm508_vm1, %v551_v59, %v555_v60  ;;  %v2954_v13 = vld [vmem:[%s3671_s16 + $0x24] sm:$0xe]  ;;  %v1066_v15 = vshll.u32 %v3799_v3, 16  ;;  %v793_v18 = vsel %vm781_vm0, %v791_v5, %v792_v6  ;;  %v2973_v27 = vld [vmem:[%s3671_s16 + $0x34] sm:$0xf] }
  0x2e   : > { %v1063_v19 = vrot.slane %v1061_v7, 1  ;;  %v1047_v20 = vshrl.u32 %v3082_v2, 16  ;;  %v1051_v24 = vrot.slane %v1049_v10, 1  ;;  %v1054_v25 = vshll.u32 %v3484_v11, 16  ;;  %v194_v38 = vld [vmem:[%s3671_s16 + $0x30] sm:$0xf] }
  0x2f   : > { %1728 = vrot.lane.b32.xlu1 %v1557_v40, %s3630_s27  ;;  %v788_v8 = vrot.slane %v3066_v0, 1  ;;  %v3115_v28 = vcombine.low %v2955_v12, %v2911_v54  ;;  %v3114_v30 = vcombine.low %v2954_v13, %v2909_v56  ;;  %v3131_v32 = vcombine.low %v2974_v21, %v3815_v22  ;;  %v3825_v39 = vld [vmem:[%s3671_s16 + $0x34] sm:$0xf]  ;;  %v3830_v45 = vld [vmem:[%s3671_s16 + $0x44] ss:$0 sps:$4 sm:$0x11]  }
  0x30   : > { %v1064_v33 = vor.u32 %v1063_v19, %v1059_v14  ;;  %v1068_v34 = vrot.slane %v1066_v15, 1  ;;  %v3130_v35 = vcombine.low %v2972_v26, %v2973_v27  ;;  %v1052_v36 = vor.u32 %v1051_v24, %v1047_v20  ;;  %v3490_v49 = vld [vmem:[%s3671_s16 + $0x38] ss:$0 sps:$4 sm:$0x11]   ;;  %v197_v53 = vld [vmem:[%s3671_s16 + $0x40] sm:$0xf] }
  0x31   : > { %1726 = vrot.lane.b32.xlu0 %v1545_v52, %s3630_s27  ;;  %v790_v17 = vsel %vm781_vm0, %v788_v8, %v789_v9  ;;  %v1056_v37 = vrot.slane %v1054_v25, 1  ;;  %v1303_v40 = vrot.slane %v3115_v28, 1  ;;  %v1304_v41 = vrot.slane %v3799_v3, 1  ;;  %v196_v52 = vld [vmem:[%s3671_s16 + $0x3c] sm:$0xf] }
  0x32   : > { %v1300_v42 = vrot.slane %v3114_v30, 1  ;;  %v1301_v43 = vrot.slane %v3484_v11, 1  ;;  %v1573_v44 = vshll.u32 %v3131_v32, 16  ;;  %v1069_v46 = vsel %vm508_vm1, %v1064_v33, %v1068_v34  ;;  %v3494_v8 = vld [vmem:[%s3671_s16 + $0x44] ss:$0 sps:$4 sm:$0x11]  }
  0x33   : > { %705 = vrot.lane.b32.xlu1 %v544_v48, %s3627_s20  ;;  %v1561_v47 = vshll.u32 %v3130_v35, 16  ;;  %v3836_v50 = vcombine.low %v194_v38, %v3825_v39  ;;  %v1057_v51 = vsel %vm508_vm1, %v1052_v36, %v1056_v37  ;;  %v1571_v54 = vshrl.u32 %v3131_v32, 16  ;;  %v3018_v48 = vld [vmem:[%s3671_s16 + $0x30] sm:$0xe]  ;;  %v239_v24 = vld [vmem:[%s3671_s16 + $0x3c] sm:$0xe] }
  0x34   : > { %v1575_v55 = vrot.slane %v1573_v44, 1  ;;  %v1578_v56 = vshll.u32 %v3830_v45, 16  ;;  %v1305_v58 = vsel %vm781_vm0, %v1303_v40, %v1304_v41  ;;  %v3850_v60 = vcombine.low %v196_v52, %v197_v53  ;;  %v2915_v26 = vld [vmem:[%s3671_s16 + $0x4c] sm:$0xf]  ;;  %v2912_v28 = vld [vmem:[%s3671_s16 + $0x3c] sm:$0xf] }
  0x35   : > { %1854 = vrot.lane.b32.xlu0 %v1808_v57, %s3631_s28  ;;  %v3844_v57 = vld [vmem:[%s3671_s16 + $0x38] ss:$0 sps:$4 sm:$0x11]   ;;  %v560_v59 = vshll.u32 %v3836_v50, 16  ;;  %v1559_v62 = vshrl.u32 %v3130_v35, 16  ;;  %v1563_v63 = vrot.slane %v1561_v47, 1  ;;  %v3162_v3 = vcombine.low %v3018_v48, %v2973_v27 }
  0x36   : > { %v1566_v0 = vshll.u32 %v3490_v49, 16  ;;  %v1580_v5 = vrot.slane %v1578_v56, 1  ;;  %v565_v6 = vshll.u32 %v3844_v57, 16  ;;  %v558_v7 = vshrl.u32 %v3836_v50, 16  ;;  %v238_v27 = vld [vmem:[%s3671_s16 + $0x30] sm:$0xe] }
  0x37   : > { %707 = vrot.lane.b32.xlu1 %v556_v4, %s3627_s20  ;;  %v1576_v4 = vor.u32 %v1575_v55, %v1571_v54  ;;  %v572_v9 = vshll.u32 %v3850_v60, 16  ;;  %v1564_v10 = vor.u32 %v1563_v63, %v1559_v62  ;;  %v1812_v15 = vrot.slane %v3162_v3, 1  ;;  %v2913_v30 = vld [vmem:[%s3671_s16 + $0x40] sm:$0xf]  ;;  %v2978_v54 = vld [vmem:[%s3671_s16 + $0x54] sm:$0xf] }
  0x38   : > { %v1568_v11 = vrot.slane %v1566_v0, 1  ;;  %v567_v14 = vrot.slane %v565_v6, 1  ;;  %v570_v20 = vshrl.u32 %v3850_v60, 16  ;;  %v3069_v33 = vcombine.low %v239_v24, %v197_v53  ;;  %v3502_v53 = vld [vmem:[%s3671_s16 + $0x44] ss:$0 sps:$4 sm:$0x11]  }
  0x39   : > { %1856 = vrot.lane.b32.xlu0 %v1811_v1, %s3631_s28  ;;  %v562_v1 = vrot.slane %v560_v59, 1  ;;  %v1581_v13 = vsel %vm508_vm1, %v1576_v4, %v1580_v5  ;;  %v574_v21 = vrot.slane %v572_v9, 1  ;;  %v1816_v40 = vrot.slane %v3830_v45, 1  ;;  %v3888_v55 = vld [vmem:[%s3671_s16 + $0x58] sm:$0xf] }
  0x3a   : > { %v1569_v25 = vsel %vm508_vm1, %v1564_v10, %v1568_v11  ;;  %v3068_v41 = vcombine.low %v238_v27, %v3825_v39  ;;  %v797_v44 = vrot.slane %v3069_v33, 1  ;;  %v795_v52 = vrot.slane %v3844_v57, 1  ;;  %v2956_v62 = vld [vmem:[%s3671_s16 + $0x3c] sm:$0xe]  ;;  %v2976_v4 = vld [vmem:[%s3671_s16 + $0x48] sm:$0xf] }
  0x3b   : > { %836 = vrot.lane.b32.xlu1 %v793_v18, %s3626_s19  ;;  %v1813_v18 = vrot.slane %v3490_v49, 1  ;;  %v563_v19 = vor.u32 %v562_v1, %v558_v7  ;;  %v3501_v49 = vld [vmem:[%s3671_s16 + $0x50] ss:$0 sps:$4 sm:$0x11]   ;;  %v3133_v3 = vcombine.low %v2978_v54, %v3888_v55  ;;  %v3898_v5 = vld [vmem:[%s3671_s16 + $0x4c] sm:$0xf]  ;;  %v3116_v7 = vcombine.low %v2956_v62, %v2913_v30 }
  0x3c   : > { %v794_v45 = vrot.slane %v3068_v41, 1  ;;  %v198_v9 = vld [vmem:[%s3671_s16 + $0x48] sm:$0xf]  ;;  %v3904_v10 = vld [vmem:[%s3671_s16 + $0x4c] sm:$0xf] }
  0x3d   : > { %834 = vrot.lane.b32.xlu0 %v790_v17, %s3626_s19  ;;  %v577_v17 = vshll.u32 %v3494_v8, 16  ;;  %v568_v34 = vsel %vm508_vm1, %v563_v19, %v567_v14  ;;  %v1814_v38 = vsel %vm781_vm0, %v1812_v15, %v1813_v18  ;;  %v1597_v14 = vshll.u32 %v3133_v3, 16  ;;  %v3909_v19 = vld [vmem:[%s3671_s16 + $0x5c] ss:$0 sps:$4 sm:$0x11]  }
  0x3e   : > { %v796_v57 = vsel %vm781_vm0, %v794_v45, %v795_v52  ;;  %v1310_v18 = vrot.slane %v3501_v49, 1  ;;  %v3917_v24 = vld [vmem:[%s3671_s16 + $0x50] ss:$0 sps:$4 sm:$0x11]   ;;  %v200_v27 = vld [vmem:[%s3671_s16 + $0x54] sm:$0xf] }
  0x3f   : > { %948 = vrot.lane.b32.xlu1 %v3083_v61, %s3624_s17  ;;  %v1302_v61 = vsel %vm781_vm0, %v1300_v42, %v1301_v43  ;;  %v579_v36 = vrot.slane %v577_v17, 1  ;;  %v3084_v42 = vcombine.low %v2912_v28, %v2913_v30  ;;  %v1306_v17 = vrot.slane %v3116_v7, 1  ;;  %v3922_v28 = vld [vmem:[%s3671_s16 + $0x58] sm:$0xf]  ;;  %v2916_v7 = vld [vmem:[%s3671_s16 + $0x54] sm:$0xf] }
  0x40   : > { %v1595_v30 = vshrl.u32 %v3133_v3, 16  ;;  %v1602_v33 = vshll.u32 %v3909_v19, 16  ;;  %v3512_v52 = vld [vmem:[%s3671_s16 + $0x5c] ss:$0 sps:$4 sm:$0x11]  }
  0x41   : > { %946 = vrot.lane.b32.xlu0 %v3082_v2, %s3624_s17  ;;  %v3019_v2 = vld [vmem:[%s3671_s16 + $0x3c] sm:$0xe]  ;;  %v1073_v39 = vshll.u32 %v3084_v42, 16  ;;  %v1071_v63 = vshrl.u32 %v3084_v42, 16 }
  0x42   : > { %v3163_v12 = vcombine.low %v3019_v2, %v3815_v22  ;;  %v2914_v22 = vld [vmem:[%s3671_s16 + $0x48] sm:$0xf]  ;;  %v1078_v2 = vshll.u32 %v3502_v53, 16 }
  0x43   : > { %1220 = vrot.lane.b32.xlu1 %v1069_v46, %s3628_s23  ;;  %v3085_v37 = vcombine.low %v2914_v22, %v2915_v26  ;;  %v798_v46 = vrot.slane %v3494_v8, 1  ;;  %v1075_v0 = vrot.slane %v1073_v39, 1  ;;  %v1307_v22 = vrot.slane %v3502_v53, 1 }
  0x45   : > { %1218 = vrot.lane.b32.xlu0 %v1057_v51, %s3628_s23  ;;  %v1085_v47 = vshll.u32 %v3085_v37, 16  ;;  %v799_v56 = vsel %vm781_vm0, %v797_v44, %v798_v46  ;;  %v1083_v48 = vshrl.u32 %v3085_v37, 16  ;;  %v1076_v11 = vor.u32 %v1075_v0, %v1071_v63  ;;  %v3020_v44 = vld [vmem:[%s3671_s16 + $0x48] sm:$0xe] }
  0x46   : > { %v3164_v53 = vcombine.low %v3020_v44, %v3898_v5 }
  0x47   : > { %1348 = vrot.lane.b32.xlu1 %v1305_v58, %s3625_s18  ;;  %v2957_v58 = vld [vmem:[%s3671_s16 + $0x48] sm:$0xe]  ;;  %v1087_v59 = vrot.slane %v1085_v47, 1  ;;  %v1604_v47 = vrot.slane %v1602_v33, 1 }
  0x48   : > { %v3117_v6 = vcombine.low %v2957_v58, %v2915_v26 }
  0x49   : > { %1346 = vrot.lane.b32.xlu0 %v1302_v61, %s3625_s18  ;;  %v1090_v61 = vshll.u32 %v3501_v49, 16  ;;  %v1088_v1 = vor.u32 %v1087_v59, %v1083_v48 }
  0x4a   : > { %v1309_v15 = vrot.slane %v3117_v6, 1  ;;  %v240_v6 = vld [vmem:[%s3671_s16 + $0x48] sm:$0xe] }
  0x4b   : > { %1460 = vrot.lane.b32.xlu1 %v3131_v32, %s3629_s26  ;;  %v1815_v32 = vrot.slane %v3163_v12, 1  ;;  %v1092_v8 = vrot.slane %v1090_v61, 1  ;;  %v1080_v12 = vrot.slane %v1078_v2, 1  ;;  %v241_v61 = vld [vmem:[%s3671_s16 + $0x54] sm:$0xe]  ;;  %v601_v2 = vshll.u32 %v3512_v52, 16 }
  0x4d   : > { %1458 = vrot.lane.b32.xlu0 %v3130_v35, %s3629_s26  ;;  %v575_v35 = vor.u32 %v574_v21, %v570_v20  ;;  %v1817_v51 = vsel %vm781_vm0, %v1815_v32, %v1816_v40  ;;  %v3912_v20 = vcombine.low %v198_v9, %v3904_v10  ;;  %v1093_v21 = vsel %vm508_vm1, %v1088_v1, %v1092_v8  ;;  %v3961_v1 = vld [vmem:[%s3671_s16 + $0x58] sm:$0xf]  ;;  %v3545_v8 = vld [vmem:[%s5039_s1 + $0x10] ss:$0 sps:$4 sm:$0x33]  }
  0x4e   : > { %v1599_v32 = vrot.slane %v1597_v14, 1  ;;  %3420 = vmatprep.subr.msk.bf16.mxu0 %vm2268_vm2, %v3545_v8  ;;  %3421 = vmatprep.subr.msk.bf16.mxu1 %vm2268_vm2, %v3545_v8 }
  0x4f   : > { %1732 = vrot.lane.b32.xlu1 %v1581_v13, %s3630_s27  ;;  %v580_v43 = vsel %vm508_vm1, %v575_v35, %v579_v36  ;;  %v3132_v13 = vcombine.low %v2976_v4, %v3898_v5  ;;  %v584_v35 = vshll.u32 %v3912_v20, 16  ;;  %v1311_v36 = vsel %vm781_vm0, %v1309_v15, %v1310_v18  ;;  %v3954_v4 = vld [vmem:[%s3671_s16 + $0x64] sm:$0xf] }
  0x50   : > { %v1600_v46 = vor.u32 %v1599_v32, %v1595_v30  ;;  %v582_v49 = vshrl.u32 %v3912_v20, 16  ;;  %v1818_v5 = vrot.slane %v3164_v53, 1  ;;  %v603_v15 = vrot.slane %v601_v2, 1  ;;  %v4005_v2 = vld [vmem:[%s3671_s16 + $0x74] ss:$0 sps:$4 sm:$0x11]  }
  0x51   : > { %1730 = vrot.lane.b32.xlu0 %v1569_v25, %s3630_s27  ;;  %v1081_v25 = vsel %vm508_vm1, %v1076_v11, %v1080_v12  ;;  %v1585_v26 = vshll.u32 %v3132_v13, 16  ;;  %v1583_v40 = vshrl.u32 %v3132_v13, 16  ;;  %v3071_v11 = vcombine.low %v241_v61, %v3922_v28 }
  0x52   : > { %v1605_v48 = vsel %vm508_vm1, %v1600_v46, %v1604_v47 }
  0x53   : > { %709 = vrot.lane.b32.xlu1 %v568_v34, %s3627_s20  ;;  %v3927_v34 = vld [vmem:[%s3671_s16 + $0x50] ss:$0 sps:$4 sm:$0x11]   ;;  %v1587_v41 = vrot.slane %v1585_v26, 1  ;;  %v804_v26 = vrot.slane %v3512_v52, 1 }
  0x54   : > { %v589_v45 = vshll.u32 %v3927_v34, 16  ;;  %v801_v33 = vrot.slane %v3927_v34, 1  ;;  %v2958_v34 = vld [vmem:[%s3671_s16 + $0x54] sm:$0xe]  ;;  %v2980_v52 = vld [vmem:[%s3671_s16 + $0x60] sm:$0xf] }
  0x55   : > { %1858 = vrot.lane.b32.xlu0 %v1814_v38, %s3631_s28  ;;  %v1308_v38 = vsel %vm781_vm0, %v1306_v17, %v1307_v22  ;;  %v1588_v54 = vor.u32 %v1587_v41, %v1583_v40  ;;  %v3070_v17 = vcombine.low %v240_v6, %v3904_v10  ;;  %v803_v22 = vrot.slane %v3071_v11, 1  ;;  %v3520_v10 = vld [vmem:[%s3671_s16 + $0x5c] ss:$0 sps:$4 sm:$0x11]   ;;  %v3986_v40 = vld [vmem:[%s3671_s16 + $0x70] sm:$0xf] }
  0x56   : > { %v591_v59 = vrot.slane %v589_v45, 1  ;;  %v2959_v41 = vld [vmem:[%s3671_s16 + $0x60] sm:$0xe]  ;;  %v1102_v46 = vshll.u32 %v3520_v10, 16  ;;  %v4016_v11 = vld [vmem:[%s3671_s16 + $0x70] sm:$0xf] }
  0x57   : > { %711 = vrot.lane.b32.xlu1 %v580_v43, %s3627_s20  ;;  %v3021_v43 = vld [vmem:[%s3671_s16 + $0x54] sm:$0xe]  ;;  %v800_v32 = vrot.slane %v3070_v17, 1  ;;  %v3119_v53 = vcombine.low %v2959_v41, %v3954_v4 }
  0x58   : > { %v3165_v58 = vcombine.low %v3021_v43, %v3888_v55 }
  0x59   : > { %1860 = vrot.lane.b32.xlu0 %v1817_v51, %s3631_s28  ;;  %v586_v51 = vrot.slane %v584_v35, 1  ;;  %v802_v47 = vsel %vm781_vm0, %v800_v32, %v801_v33 }
  0x5a   : > { %v1821_v9 = vrot.slane %v3165_v58, 1 }
  0x5b   : > { %840 = vrot.lane.b32.xlu1 %v799_v56, %s3626_s19  ;;  %v587_v62 = vor.u32 %v586_v51, %v582_v49 }
  0x5d   : > { %838 = vrot.lane.b32.xlu0 %v796_v57, %s3626_s19  ;;  %v2918_v57 = vld [vmem:[%s3671_s16 + $0x60] sm:$0xf] }
  0x5e   : > { %v3087_v12 = vcombine.low %v2918_v57, %v3954_v4  ;;  %v202_v57 = vld [vmem:[%s3671_s16 + $0x60] sm:$0xf] }
  0x5f   : > { %952 = vrot.lane.b32.xlu1 %v3085_v37, %s3624_s17  ;;  %v3933_v37 = vcombine.low %v200_v27, %v3922_v28  ;;  %v3519_v28 = vld [vmem:[%s3671_s16 + $0x68] ss:$0 sps:$4 sm:$0x11]  }
  0x60   : > { %v1109_v27 = vshll.u32 %v3087_v12, 16  ;;  %v1114_v44 = vshll.u32 %v3519_v28, 16 }
  0x61   : > { %950 = vrot.lane.b32.xlu0 %v3084_v42, %s3624_s17  ;;  %v1590_v42 = vshll.u32 %v3917_v24, 16  ;;  %v596_v39 = vshll.u32 %v3933_v37, 16  ;;  %v594_v63 = vshrl.u32 %v3933_v37, 16 }
  0x62   : > { %v1111_v43 = vrot.slane %v1109_v27, 1  ;;  %v1116_v58 = vrot.slane %v1114_v44, 1  ;;  %v3023_v44 = vld [vmem:[%s3671_s16 + $0x6c] sm:$0xe] }
  0x63   : > { %1224 = vrot.lane.b32.xlu1 %v1093_v21, %s3628_s23  ;;  %v1592_v56 = vrot.slane %v1590_v42, 1  ;;  %v598_v0 = vrot.slane %v596_v39, 1  ;;  %v1822_v21 = vrot.slane %v3909_v19, 1  ;;  %v1107_v42 = vshrl.u32 %v3087_v12, 16  ;;  %v2981_v39 = vld [vmem:[%s3671_s16 + $0x64] sm:$0xf] }
  0x64   : > { %v3134_v61 = vcombine.low %v2980_v52, %v2981_v39 }
  0x65   : > { %1222 = vrot.lane.b32.xlu0 %v1081_v25, %s3628_s23  ;;  %v1593_v55 = vsel %vm508_vm1, %v1588_v54, %v1592_v56  ;;  %v599_v14 = vor.u32 %v598_v0, %v594_v63  ;;  %v2270_v25 = vsel %vm2268_vm2, %v3545_v8, 0  ;;  %v1823_v30 = vsel %vm781_vm0, %v1821_v9, %v1822_v21  ;;  %v204_v9 = vld [vmem:[%s3671_s16 + $0x6c] sm:$0xf]  ;;  %v3022_v21 = vld [vmem:[%s3671_s16 + $0x60] sm:$0xe] }
  0x66   : > { %3381 = vmatpush3.bf16.msra.mxu0 %v2270_v25  ;;  %3419 = vmatpush3.bf16.msra.mxu1 %v2270_v25  ;;  %v3118_v54 = vcombine.low %v2958_v34, %v3961_v1  ;;  %v1112_v56 = vor.u32 %v1111_v43, %v1107_v42  ;;  %v1315_v0 = vrot.slane %v3119_v53, 1  ;;  %v1609_v8 = vshll.u32 %v3134_v61, 16 }
  0x67   : > { %1352 = vrot.lane.b32.xlu1 %v1311_v36, %s3625_s18  ;;  %v604_v19 = vsel %vm508_vm1, %v599_v14, %v603_v15  ;;  %v805_v36 = vsel %vm781_vm0, %v803_v22, %v804_v26  ;;  %v1626_v14 = vshll.u32 %v4005_v2, 16  ;;  %v4021_v15 = vld [vmem:[%s3671_s16 + $0x68] ss:$0 sps:$4 sm:$0x11]   ;;  %v1607_v22 = vshrl.u32 %v3134_v61, 16 }
  0x68   : > { %v1117_v4 = vsel %vm508_vm1, %v1112_v56, %v1116_v58  ;;  %v1611_v26 = vrot.slane %v1609_v8, 1  ;;  %v613_v33 = vshll.u32 %v4021_v15, 16  ;;  %v3167_v58 = vcombine.low %v3023_v44, %v3986_v40 }
  0x69   : > { %1350 = vrot.lane.b32.xlu0 %v1308_v38, %s3625_s18  ;;  %v2982_v38 = vld [vmem:[%s3671_s16 + $0x6c] sm:$0xf]  ;;  %v1628_v32 = vrot.slane %v1626_v14, 1 }
  0x6a   : > { %v3135_v45 = vcombine.low %v2982_v38, %v3986_v40  ;;  %v3530_v38 = vld [vmem:[%s3671_s16 + $0x74] ss:$0 sps:$4 sm:$0x11]   ;;  %v1612_v42 = vor.u32 %v1611_v26, %v1607_v22  ;;  %v1827_v8 = vrot.slane %v3167_v58, 1  ;;  %v807_v26 = vrot.slane %v4021_v15, 1 }
  0x6b   : > { %1464 = vrot.lane.b32.xlu1 %v3133_v3, %s3629_s26  ;;  %v1819_v3 = vrot.slane %v3917_v24, 1  ;;  %v3086_v24 = vcombine.low %v2916_v7, %v3961_v1  ;;  %v1313_v1 = vrot.slane %v3520_v10, 1  ;;  %v3166_v10 = vcombine.low %v3022_v21, %v2981_v39 }
  0x6c   : > { %v1621_v63 = vshll.u32 %v3135_v45, 16  ;;  %v625_v56 = vshll.u32 %v3530_v38, 16  ;;  %v810_v14 = vrot.slane %v3530_v38, 1 }
  0x6d   : > { %1462 = vrot.lane.b32.xlu0 %v3132_v13, %s3629_s26  ;;  %v592_v13 = vsel %vm508_vm1, %v587_v62, %v591_v59  ;;  %v1820_v18 = vsel %vm781_vm0, %v1818_v5, %v1819_v3  ;;  %v1097_v35 = vshll.u32 %v3086_v24, 16  ;;  %v1095_v49 = vshrl.u32 %v3086_v24, 16  ;;  %v4001_v62 = vld [vmem:[%s3671_s16 + $0x64] sm:$0xf] }
  0x6e   : > { %v1312_v5 = vrot.slane %v3118_v54, 1  ;;  %v3526_v3 = vld [vmem:[%s3671_s16 + $0x68] ss:$0 sps:$4 sm:$0x11]   ;;  %v4011_v6 = vcombine.low %v202_v57, %v4001_v62  ;;  %v1824_v34 = vrot.slane %v3166_v10, 1 }
  0x6f   : > { %1736 = vrot.lane.b32.xlu1 %v1605_v48, %s3630_s27  ;;  %v1099_v51 = vrot.slane %v1097_v35, 1  ;;  %v1104_v48 = vrot.slane %v1102_v46, 1  ;;  %v1614_v27 = vshll.u32 %v3526_v3, 16  ;;  %v2922_v57 = vld [vmem:[%s3671_s16 + $0x78] sm:$0xf] }
  0x70   : > { %v608_v17 = vshll.u32 %v4011_v6, 16  ;;  %v1314_v25 = vsel %vm781_vm0, %v1312_v5, %v1313_v1  ;;  %v606_v35 = vshrl.u32 %v4011_v6, 16  ;;  %v4090_v10 = vld [vmem:[%s3671_s16 + $0x74] ss:$0 sps:$4 sm:$0x11]  }
  0x71   : > { %1734 = vrot.lane.b32.xlu0 %v1593_v55, %s3630_s27  ;;  %v1100_v59 = vor.u32 %v1099_v51, %v1095_v49  ;;  %v1316_v55 = vrot.slane %v3519_v28, 1  ;;  %v1616_v43 = vrot.slane %v1614_v27, 1  ;;  %v1825_v49 = vrot.slane %v3526_v3, 1  ;;  %v243_v51 = vld [vmem:[%s3671_s16 + $0x6c] sm:$0xe] }
  0x72   : > { %v627_v3 = vrot.slane %v625_v56, 1 }
  0x73   : > { %713 = vrot.lane.b32.xlu1 %v592_v13, %s3627_s20  ;;  %v1105_v7 = vsel %vm508_vm1, %v1100_v59, %v1104_v48  ;;  %v1623_v13 = vrot.slane %v1621_v63, 1  ;;  %v1617_v59 = vsel %vm508_vm1, %v1612_v42, %v1616_v43  ;;  %v4056_v63 = vld [vmem:[%s3671_s16 + $0x7c] sm:$0xf]  ;;  %v2986_v42 = vld [vmem:[%s3671_s16 + $0x84] sm:$0xf] }
  0x74   : > { %v4102_v43 = vld [vmem:[%s3671_s16 + $0x88] sm:$0xf] }
  0x75   : > { %1862 = vrot.lane.b32.xlu0 %v1820_v18, %s3631_s28  ;;  %v1317_v18 = vsel %vm781_vm0, %v1315_v0, %v1316_v55  ;;  %v2920_v0 = vld [vmem:[%s3671_s16 + $0x6c] sm:$0xf]  ;;  %v3073_v55 = vcombine.low %v243_v51, %v4016_v11  ;;  %v4110_v51 = vld [vmem:[%s3671_s16 + $0x7c] sm:$0xf] }
  0x77   : > { %715 = vrot.lane.b32.xlu1 %v604_v19, %s3627_s20 }
  0x79   : > { %1864 = vrot.lane.b32.xlu0 %v1823_v30, %s3631_s28 }
  0x7b   : > { %844 = vrot.lane.b32.xlu1 %v805_v36, %s3626_s19  ;;  %v610_v36 = vrot.slane %v608_v17, 1  ;;  %v809_v17 = vrot.slane %v3073_v55, 1  ;;  %v206_v55 = vld [vmem:[%s3671_s16 + $0x78] sm:$0xf] }
  0x7d   : > { %842 = vrot.lane.b32.xlu0 %v802_v47, %s3626_s19  ;;  %v615_v47 = vrot.slane %v613_v33, 1  ;;  %v611_v39 = vor.u32 %v610_v36, %v606_v35  ;;  %v2960_v33 = vld [vmem:[%s3671_s16 + $0x6c] sm:$0xe]  ;;  %v811_v15 = vsel %vm781_vm0, %v809_v17, %v810_v14 }
  0x7f   : > { %956 = vrot.lane.b32.xlu1 %v3087_v12, %s3624_s17  ;;  %v1619_v12 = vshrl.u32 %v3135_v45, 16  ;;  %v616_v40 = vsel %vm508_vm1, %v611_v39, %v615_v47 }
  0x81   : > { %954 = vrot.lane.b32.xlu0 %v3086_v24, %s3624_s17  ;;  %v4028_v24 = vcombine.low %v204_v9, %v4016_v11  ;;  %v1624_v30 = vor.u32 %v1623_v13, %v1619_v12  ;;  %v1828_v9 = vrot.slane %v4005_v2, 1 }
  0x83   : > { %1228 = vrot.lane.b32.xlu1 %v1117_v4, %s3628_s23  ;;  %v620_v41 = vshll.u32 %v4028_v24, 16  ;;  %v1629_v46 = vsel %vm508_vm1, %v1624_v30, %v1628_v32  ;;  %v618_v53 = vshrl.u32 %v4028_v24, 16  ;;  %v4060_v4 = vld [vmem:[%s3671_s16 + $0x70] sm:$0xf]  ;;  %v2961_v32 = vld [vmem:[%s3671_s16 + $0x78] sm:$0xe] }
  0x84   : > { %v4075_v13 = vcombine.low %v2920_v0, %v4060_v4  ;;  %v3120_v56 = vcombine.low %v2960_v33, %v4060_v4 }
  0x85   : > { %1226 = vrot.lane.b32.xlu0 %v1105_v7, %s3628_s23  ;;  %v622_v54 = vrot.slane %v620_v41, 1  ;;  %v4068_v7 = vcombine.low %v2922_v57, %v4056_v63 }
  0x86   : > { %v1121_v27 = vshll.u32 %v4075_v13, 16  ;;  %v1119_v41 = vshrl.u32 %v4075_v13, 16 }
  0x87   : > { %1356 = vrot.lane.b32.xlu1 %v1317_v18, %s3625_s18  ;;  %v4032_v19 = vpop.permute.xlu1 %944  ;;  %v623_v5 = vor.u32 %v622_v54, %v618_v53  ;;  %v4079_v18 = vld [vmem:[%s3671_s16 + $0x80] ss:$0 sps:$4 sm:$0x11]   ;;  %v1133_v2 = vshll.u32 %v4068_v7, 16  ;;  %v1131_v35 = vshrl.u32 %v4068_v7, 16  ;;  %v3121_v54 = vcombine.low %v2961_v32, %v4056_v63 }
  0x88   : > { %v4034_v28 = vpop.permute.xlu0 %942  ;;  %v1138_v36 = vshll.u32 %v4079_v18, 16  ;;  %v1123_v47 = vrot.slane %v1121_v27, 1 }
  0x89   : > { %1354 = vrot.lane.b32.xlu0 %v1314_v25, %s3625_s18  ;;  %v628_v21 = vsel %vm508_vm1, %v623_v5, %v627_v3  ;;  %v1135_v38 = vrot.slane %v1133_v2, 1  ;;  %v1321_v5 = vrot.slane %v3121_v54, 1  ;;  %v1322_v3 = vrot.slane %v4079_v18, 1  ;;  %v3025_v54 = vld [vmem:[%s3671_s16 + $0x84] sm:$0xe] }
  0x8a   : > { %v1124_v4 = vor.u32 %v1123_v47, %v1119_v41 }
  0x8b   : > { %1468 = vrot.lane.b32.xlu1 %v3135_v45, %s3629_s26  ;;  %v242_v45 = vld [vmem:[%s3671_s16 + $0x60] sm:$0xe]  ;;  %v1323_v27 = vsel %vm781_vm0, %v1321_v5, %v1322_v3 }
  0x8c   : > { %v4046_v52 = vpop.permute.xlu0 %1342  ;;  %v3072_v12 = vcombine.low %v242_v45, %v4001_v62  ;;  %v1829_v62 = vsel %vm781_vm0, %v1827_v8, %v1828_v9  ;;  %v4118_v45 = vcombine.low %v2986_v42, %v4102_v43  ;;  %v1318_v8 = vrot.slane %v3120_v56, 1 }
  0x8d   : > { %1466 = vrot.lane.b32.xlu0 %v3134_v61, %s3629_s26  ;;  %v4051_v48 = vpop.permute.xlu1 %830  ;;  %v1826_v61 = vsel %vm781_vm0, %v1824_v34, %v1825_v49  ;;  %v1126_v34 = vshll.u32 %v4090_v10, 16  ;;  %v2984_v49 = vld [vmem:[%s3671_s16 + $0x78] sm:$0xf]  ;;  %v1319_v9 = vrot.slane %v4090_v10, 1 }
  0x8e   : > { %v806_v22 = vrot.slane %v3072_v12, 1  ;;  %v4124_v57 = vcombine.low %v2984_v49, %v4110_v51  ;;  %v1645_v12 = vshll.u32 %v4118_v45, 16 }
  0x8f   : > { %1740 = vrot.lane.b32.xlu1 %v1629_v46, %s3630_s27  ;;  %v1320_v10 = vsel %vm781_vm0, %v1318_v8, %v1319_v9 }
  0x90   : > { %v808_v46 = vsel %vm781_vm0, %v806_v22, %v807_v26  ;;  %v208_v22 = vld [vmem:[%s3671_s16 + $0x84] sm:$0xf]  ;;  %v1647_v32 = vrot.slane %v1645_v12, 1  ;;  %v3169_v12 = vcombine.low %v3025_v54, %v4102_v43 }
  0x91   : > { %1738 = vrot.lane.b32.xlu0 %v1617_v59, %s3630_s27  ;;  %v4070_v1 = vpop.permute.xlu1 %832  ;;  %v1140_v59 = vrot.slane %v1138_v36, 1  ;;  %v1631_v36 = vshrl.u32 %v4124_v57, 16 }
  0x93   : > { %v702_v11 = vpop.permute.xlu0 %701  ;;  %717 = vrot.lane.b32.xlu1 %v616_v40, %s3627_s20  ;;  %v4132_v40 = vld [vmem:[%s3671_s16 + $0x7c] sm:$0xf] }
  0x94   : > { %v1888_v39 = vsel %vm1886_vm3, %v3699_v23, %v702_v11  ;;  %v1136_v23 = vor.u32 %v1135_v38, %v1131_v35  ;;  %v4142_v11 = vld [vmem:[%s3671_s16 + $0x8c] ss:$0 sps:$4 sm:$0x11]   ;;  %v4170_v35 = vld [vmem:[%s3671_s16 + $0x80] ss:$0 sps:$4 sm:$0x11]  }
  0x95   : > { %1866 = vrot.lane.b32.xlu0 %v1826_v61, %s3631_s28  ;;  %v4084_v25 = vpop.permute.xlu1 %1344  ;;  %v1921_v63 = vsel %vm1919_vm4, %v1888_v39, %v4051_v48  ;;  %v1128_v61 = vrot.slane %v1126_v34, 1  ;;  %v1650_v33 = vshll.u32 %v4142_v11, 16  ;;  %v3024_v39 = vld [vmem:[%s3671_s16 + $0x78] sm:$0xe] }
  0x96   : > { %v1954_v14 = vsel %vm1952_vm5, %v1921_v63, %v4034_v28  ;;  %v1141_v18 = vsel %vm508_vm1, %v1136_v23, %v1140_v59  ;;  %v4160_v28 = vld [vmem:[%s3671_s16 + $0x88] sm:$0xf]  ;;  %v3168_v5 = vcombine.low %v3024_v39, %v4110_v51 }
  0x97   : > { %v704_v30 = vpop.permute.xlu0 %703  ;;  %719 = vrot.lane.b32.xlu1 %v628_v21, %s3627_s20  ;;  %v4151_v21 = vld [vmem:[%s3671_s16 + $0x80] ss:$0 sps:$4 sm:$0x11]   ;;  %v4178_v38 = vcombine.low %v208_v22, %v4160_v28 }
  0x98   : > { %v1890_v58 = vsel %vm1886_vm3, %v3704_v29, %v704_v30  ;;  %v1643_v30 = vshrl.u32 %v4118_v45, 16  ;;  %v1831_v22 = vrot.slane %v4151_v21, 1 }
  0x99   : > { %1868 = vrot.lane.b32.xlu0 %v1829_v62, %s3631_s28  ;;  %v4104_v44 = vpop.permute.xlu1 %1216  ;;  %v1923_v48 = vsel %vm1919_vm4, %v1890_v58, %v4070_v1  ;;  %v1633_v1 = vshll.u32 %v4124_v57, 16  ;;  %v1129_v62 = vsel %vm508_vm1, %v1124_v4, %v1128_v61  ;;  %v1652_v58 = vrot.slane %v1650_v33, 1  ;;  %v4198_v4 = vld [vmem:[%s3671_s16 + $0x8c] ss:$0 sps:$4 sm:$0x11]  }
  0x9a   : > { %v1648_v56 = vor.u32 %v1647_v32, %v1643_v30  ;;  %v644_v61 = vshll.u32 %v4178_v38, 16  ;;  %v649_v43 = vshll.u32 %v4198_v4, 16  ;;  %v4231_v30 = vld [vmem:[%s3671_s16 + $0x88] sm:$0xf]  ;;  %v1833_v33 = vrot.slane %v3169_v12, 1 }
  0x9b   : > { %v1215_v53 = vpop.permute.xlu0 %1214  ;;  %848 = vrot.lane.b32.xlu1 %v811_v15, %s3626_s19  ;;  %v1635_v47 = vrot.slane %v1633_v1, 1 }
  0x9c   : > { %v1987_v17 = vsel %vm1985_vm6, %v1954_v14, %v1215_v53  ;;  %v646_v1 = vrot.slane %v644_v61, 1  ;;  %v3559_v61 = vld [vmem:[%s3671_s16 + $0x8c] ss:$0 sps:$4 sm:$0x11]  }
  0x9d   : > { %846 = vrot.lane.b32.xlu0 %v808_v46, %s3626_s19  ;;  %v4128_v0 = vpop.permute.xlu1 %1456 }
  0x9f   : > { %v1455_v29 = vpop.permute.xlu0 %1454  ;;  %960 = vrot.lane.b32.xlu1 %v4068_v7, %s3624_s17  ;;  %v4154_v7 = vcombine.low %v206_v55, %v4132_v40 }
  0xa1   : > { %958 = vrot.lane.b32.xlu0 %v4075_v13, %s3624_s17  ;;  %v1729_v2 = vpop.permute.xlu1 %1728  ;;  %v1956_v13 = vsel %vm1952_vm5, %v1923_v48, %v4032_v19  ;;  %v2020_v19 = vsel %vm2018_vm7, %v1987_v17, %v4046_v52  ;;  %v632_v15 = vshll.u32 %v4154_v7, 16  ;;  %v1638_v52 = vshll.u32 %v4151_v21, 16  ;;  %v245_v17 = vld [vmem:[%s3671_s16 + $0x84] sm:$0xe] }
  0xa2   : > { %v1989_v41 = vsel %vm1985_vm6, %v1956_v13, %v4104_v44  ;;  %v2053_v42 = vsel %vm2051_vm8, %v2020_v19, %v1455_v29  ;;  %v637_v44 = vshll.u32 %v4170_v35, 16  ;;  %v630_v59 = vshrl.u32 %v4154_v7, 16  ;;  %v2926_v13 = vld [vmem:[%s3671_s16 + $0x90] sm:$0xf] }
  0xa3   : > { %v1727_v26 = vpop.permute.xlu0 %1726  ;;  %1232 = vrot.lane.b32.xlu1 %v1141_v18, %s3628_s23  ;;  %v2022_v23 = vsel %vm2018_vm7, %v1989_v41, %v4084_v25  ;;  %v634_v63 = vrot.slane %v632_v15, 1  ;;  %v1636_v25 = vor.u32 %v1635_v47, %v1631_v36  ;;  %v1640_v3 = vrot.slane %v1638_v52, 1 }
  0xa4   : > { %v2086_v34 = vsel %vm2084_vm9, %v2053_v42, %v1727_v26  ;;  %v2055_v55 = vsel %vm2051_vm8, %v2022_v23, %v4128_v0  ;;  %v1653_v0 = vsel %vm508_vm1, %v1648_v56, %v1652_v58  ;;  %v639_v14 = vrot.slane %v637_v44, 1  ;;  %v4224_v26 = vld [vmem:[%s3671_s16 + $0x94] sm:$0xf]  ;;  %v3558_v56 = vld [vmem:[%s3671_s16 + $0x98] ss:$0 sps:$4 sm:$0x11]  }
  0xa5   : > { %1230 = vrot.lane.b32.xlu0 %v1129_v62, %s3628_s23  ;;  %v4183_v46 = vpop.permute.xlu1 %705  ;;  %v2088_v48 = vsel %vm2084_vm9, %v2055_v55, %v1729_v2  ;;  %v635_v51 = vor.u32 %v634_v63, %v630_v59  ;;  %v642_v18 = vshrl.u32 %v4178_v38, 16  ;;  %v1830_v62 = vrot.slane %v3168_v5, 1  ;;  %v2963_v5 = vld [vmem:[%s3671_s16 + $0x90] sm:$0xe] }
  0xa6   : > { %v3075_v19 = vcombine.low %v245_v17, %v4160_v28  ;;  %v651_v15 = vrot.slane %v649_v43, 1  ;;  %v3091_v41 = vcombine.low %v2926_v13, %v4224_v26  ;;  %v1834_v52 = vrot.slane %v4142_v11, 1 }
  0xa7   : > { %v1855_v49 = vpop.permute.xlu0 %1854  ;;  %1360 = vrot.lane.b32.xlu1 %v1323_v27, %s3625_s18  ;;  %v640_v21 = vsel %vm508_vm1, %v635_v51, %v639_v14  ;;  %v647_v36 = vor.u32 %v646_v1, %v642_v18  ;;  %v1832_v47 = vsel %vm781_vm0, %v1830_v62, %v1831_v22  ;;  %v813_v59 = vrot.slane %v4170_v35, 1  ;;  %v4276_v62 = vld [vmem:[%s3671_s16 + $0x94] sm:$0xf] }
  0xa8   : > { %v2119_v53 = vsel %vm2117_vm10, %v2086_v34, %v1855_v49  ;;  %v815_v11 = vrot.slane %v3075_v19, 1  ;;  %v1157_v54 = vshll.u32 %v3091_v41, 16  ;;  %v1835_v44 = vsel %vm781_vm0, %v1833_v33, %v1834_v52  ;;  %v210_v19 = vld [vmem:[%s3671_s16 + $0x90] sm:$0xf] }
  0xa9   : > { %2167 = vst.msk [vmem:[#allocation2] sm:$0xff] %vm2166_vm11, %v2119_v53  ;;  %1358 = vrot.lane.b32.xlu0 %v1320_v10, %s3625_s18  ;;  %v4203_v29 = vpop.permute.xlu1 %707  ;;  %v2924_v10 = vld [vmem:[%s3671_s16 + $0x84] sm:$0xf]  ;;  %v652_v53 = vsel %vm508_vm1, %v647_v36, %v651_v15  ;;  %v1162_v12 = vshll.u32 %v3558_v56, 16  ;;  %v1150_v18 = vshll.u32 %v3559_v61, 16  ;;  %v3123_v43 = vcombine.low %v2963_v5, %v4224_v26 }
  0xaa   : > { %v3090_v28 = vcombine.low %v2924_v10, %v4231_v30 }
  0xab   : > { %v1857_v8 = vpop.permute.xlu0 %1856  ;;  %1472 = vrot.lane.b32.xlu1 %v4118_v45, %s3629_s26  ;;  %v1641_v45 = vsel %vm508_vm1, %v1636_v25, %v1640_v3  ;;  %v2990_v25 = vld [vmem:[%s3671_s16 + $0x9c] sm:$0xf]  ;;  %v4262_v3 = vld [vmem:[%s3671_s16 + $0xa0] sm:$0xf]  ;;  %v1152_v26 = vrot.slane %v1150_v18, 1  ;;  %v1327_v15 = vrot.slane %v3123_v43, 1 }
  0xac   : > { %v2122_v9 = vsel %vm2117_vm10, %v2088_v48, %v1857_v8  ;;  %v1145_v63 = vshll.u32 %v3090_v28, 16  ;;  %v2962_v48 = vld [vmem:[%s3671_s16 + $0x84] sm:$0xe]  ;;  %v1155_v8 = vshrl.u32 %v3091_v41, 16  ;;  %v1143_v14 = vshrl.u32 %v3090_v28, 16 }
  0xad   : > { %2168 = vst.msk [vmem:[#allocation2 + $0x8] sm:$0xff] %vm2166_vm11, %v2122_v9  ;;  %1470 = vrot.lane.b32.xlu0 %v4124_v57, %s3629_s26  ;;  %v4218_v2 = vpop.permute.xlu1 %836  ;;  %v244_v57 = vld [vmem:[%s3671_s16 + $0x78] sm:$0xe]  ;;  %v1159_v9 = vrot.slane %v1157_v54, 1  ;;  %v4272_v17 = vcombine.low %v2990_v25, %v4262_v3  ;;  %v3122_v22 = vcombine.low %v2962_v48, %v4231_v30  ;;  %v1328_v30 = vrot.slane %v3558_v56, 1 }
  0xae   : > { %v3074_v34 = vcombine.low %v244_v57, %v4132_v40  ;;  %v816_v40 = vrot.slane %v4198_v4, 1  ;;  %v1147_v51 = vrot.slane %v1145_v63, 1  ;;  %v1164_v57 = vrot.slane %v1162_v12, 1 }
  0xaf   : > { %v4226_v27 = vpop.permute.xlu0 %834  ;;  %1744 = vrot.lane.b32.xlu1 %v1653_v0, %s3630_s27  ;;  %v1160_v13 = vor.u32 %v1159_v9, %v1155_v8  ;;  %v1324_v52 = vrot.slane %v3122_v22, 1  ;;  %v1329_v63 = vsel %vm781_vm0, %v1327_v15, %v1328_v30  ;;  %v4324_v8 = vld [vmem:[%s3671_s16 + $0x98] ss:$0 sps:$4 sm:$0x11]  }
  0xb0   : > { %v2183_v32 = vld [vmem:[#allocation2] sm:$0xff]  ;;  %v812_v23 = vrot.slane %v3074_v34, 1  ;;  %v817_v4 = vsel %vm781_vm0, %v815_v11, %v816_v40  ;;  %v1325_v34 = vrot.slane %v3559_v61, 1  ;;  %v4301_v40 = vld [vmem:[%s3671_s16 + $0x98] ss:$0 sps:$4 sm:$0x11]  }
  0xb1   : > { %1742 = vrot.lane.b32.xlu0 %v1641_v45, %s3630_s27  ;;  %3382 = vmatprep.mubr.msk.bf16.mxu0 %vm2166_vm11, %v2183_v32  ;;  %v4239_v42 = vpop.permute.xlu1 %948  ;;  %v2988_v45 = vld [vmem:[%s3671_s16 + $0x90] sm:$0xf]  ;;  %v1148_v32 = vor.u32 %v1147_v51, %v1143_v14  ;;  %v1165_v11 = vsel %vm508_vm1, %v1160_v13, %v1164_v57  ;;  %v1667_v61 = vshrl.u32 %v4272_v17, 16  ;;  %v1662_v43 = vshll.u32 %v4301_v40, 16 }
  0xb2   : > { %v814_v0 = vsel %vm781_vm0, %v812_v23, %v813_v59  ;;  %v4284_v33 = vcombine.low %v2988_v45, %v4276_v62  ;;  %v212_v59 = vld [vmem:[%s3671_s16 + $0x9c] sm:$0xf]  ;;  %v1326_v25 = vsel %vm781_vm0, %v1324_v52, %v1325_v34  ;;  %v3026_v45 = vld [vmem:[%s3671_s16 + $0x90] sm:$0xe] }
  0xb3   : > { %v4245_v49 = vpop.permute.xlu0 %946  ;;  %721 = vrot.lane.b32.xlu1 %v640_v21, %s3627_s20  ;;  %v4288_v21 = vld [vmem:[%s3671_s16 + $0x94] sm:$0xf]  ;;  %v1664_v52 = vrot.slane %v1662_v43, 1 }
  0xb4   : > { %v2184_v39 = vld [vmem:[#allocation2 + $0x8] sm:$0xff]  ;;  %v4304_v54 = vcombine.low %v210_v19, %v4288_v21  ;;  %v1657_v23 = vshll.u32 %v4284_v33, 16  ;;  %v1655_v48 = vshrl.u32 %v4284_v33, 16 }
  0xb5   : > { %1870 = vrot.lane.b32.xlu0 %v1832_v47, %s3631_s28  ;;  %3383 = vmatmul.mubr.msk.bf16.vlgmr.msra.gmra.mrb[0].mxu0 %vm2166_vm11, %v2184_v39  ;;  %v4253_v58 = vpop.permute.xlu1 %1220  ;;  %v1669_v47 = vshll.u32 %v4272_v17, 16  ;;  %v4293_v39 = vld [vmem:[%s3671_s16 + $0xa4] ss:$0 sps:$4 sm:$0x11]  }
  0xb6   : > { %v1659_v18 = vrot.slane %v1657_v23, 1  ;;  %v247_v23 = vld [vmem:[%s3671_s16 + $0x9c] sm:$0xe] }
  0xb7   : > { %v1219_v55 = vpop.permute.xlu0 %1218  ;;  %723 = vrot.lane.b32.xlu1 %v652_v53, %s3627_s20  ;;  %v1892_v53 = vsel %vm1886_vm3, %v3746_v16, %v4183_v46  ;;  %v4312_v16 = vld [vmem:[%s3671_s16 + $0xa0] sm:$0xf]  ;;  %v1671_v5 = vrot.slane %v1669_v47, 1  ;;  %v3170_v47 = vcombine.low %v3026_v45, %v4276_v62 }
  0xb8   : > { %v4333_v12 = vcombine.low %v212_v59, %v4312_v16 }
  0xb9   : > { %1872 = vrot.lane.b32.xlu0 %v1835_v44, %s3631_s28  ;;  %v4267_v35 = vpop.permute.xlu1 %1348  ;;  %v1153_v44 = vsel %vm508_vm1, %v1148_v32, %v1152_v26  ;;  %v1672_v22 = vor.u32 %v1671_v5, %v1667_v61  ;;  %v661_v32 = vshll.u32 %v4324_v8, 16  ;;  %v1836_v5 = vrot.slane %v3170_v47, 1 }
  0xbb   : > { %v1347_v1 = vpop.permute.xlu0 %1346  ;;  %852 = vrot.lane.b32.xlu1 %v817_v4, %s3626_s19  ;;  %v1674_v4 = vshll.u32 %v4293_v39, 16 }
  0xbd   : > { %850 = vrot.lane.b32.xlu0 %v814_v0, %s3626_s19  ;;  %v4281_v10 = vpop.permute.xlu1 %1460  ;;  %v1676_v57 = vrot.slane %v1674_v4, 1  ;;  %v4384_v4 = vld [vmem:[%s3671_s16 + $0xac] sm:$0xf] }
  0xbf   : > { %v1459_v36 = vpop.permute.xlu0 %1458  ;;  %964 = vrot.lane.b32.xlu1 %v3091_v41, %s3624_s17  ;;  %v1925_v41 = vsel %vm1919_vm4, %v1892_v53, %v4226_v27 }
  0xc0   : > { %v1958_v46 = vsel %vm1952_vm5, %v1925_v41, %v4245_v49  ;;  %v1894_v49 = vsel %vm1886_vm3, %v3764_v31, %v4203_v29 }
  0xc1   : > { %962 = vrot.lane.b32.xlu0 %v3090_v28, %s3624_s17  ;;  %v1733_v56 = vpop.permute.xlu1 %1732  ;;  %v1991_v27 = vsel %vm1985_vm6, %v1958_v46, %v1219_v55  ;;  %v656_v55 = vshll.u32 %v4304_v54, 16  ;;  %v1927_v0 = vsel %vm1919_vm4, %v1894_v49, %v4218_v2  ;;  %v4390_v49 = vld [vmem:[%s3671_s16 + $0xa0] sm:$0xf] }
  0xc2   : > { %v2024_v9 = vsel %vm2018_vm7, %v1991_v27, %v1347_v1  ;;  %v1960_v31 = vsel %vm1952_vm5, %v1927_v0, %v4239_v42  ;;  %v654_v42 = vshrl.u32 %v4304_v54, 16  ;;  %v1837_v27 = vrot.slane %v4301_v40, 1 }
  0xc3   : > { %v1731_v28 = vpop.permute.xlu0 %1730  ;;  %1236 = vrot.lane.b32.xlu1 %v1165_v11, %s3628_s23  ;;  %v2057_v14 = vsel %vm2051_vm8, %v2024_v9, %v1459_v36  ;;  %v1993_v13 = vsel %vm1985_vm6, %v1960_v31, %v4253_v58  ;;  %v658_v19 = vrot.slane %v656_v55, 1  ;;  %v4356_v58 = vld [vmem:[%s3671_s16 + $0xa4] ss:$0 sps:$4 sm:$0x11]   ;;  %v668_v36 = vshll.u32 %v4333_v12, 16 }
  0xc4   : > { %v2090_v29 = vsel %vm2084_vm9, %v2057_v14, %v1731_v28  ;;  %v2026_v26 = vsel %vm2018_vm7, %v1993_v13, %v4267_v35  ;;  %v1660_v35 = vor.u32 %v1659_v18, %v1655_v48  ;;  %v3027_v11 = vld [vmem:[%s3671_s16 + $0x9c] sm:$0xe]  ;;  %v673_v46 = vshll.u32 %v4356_v58, 16 }
  0xc5   : > { %1234 = vrot.lane.b32.xlu0 %v1153_v44, %s3628_s23  ;;  %v4338_v51 = vpop.permute.xlu1 %709  ;;  %v2059_v15 = vsel %vm2051_vm8, %v2026_v26, %v4281_v10  ;;  %v1677_v44 = vsel %vm508_vm1, %v1672_v22, %v1676_v57  ;;  %v663_v10 = vrot.slane %v661_v32, 1  ;;  %v659_v62 = vor.u32 %v658_v19, %v654_v42  ;;  %v2928_v48 = vld [vmem:[%s3671_s16 + $0x9c] sm:$0xf]  ;;  %v3574_v32 = vld [vmem:[%s3671_s16 + $0xb0] ss:$0 sps:$4 sm:$0x11]  }
  0xc6   : > { %v2092_v34 = vsel %vm2084_vm9, %v2059_v15, %v1733_v56  ;;  %v666_v56 = vshrl.u32 %v4333_v12, 16  ;;  %v670_v59 = vrot.slane %v668_v36, 1  ;;  %v3171_v28 = vcombine.low %v3027_v11, %v4262_v3 }
  0xc7   : > { %v1859_v1 = vpop.permute.xlu0 %1858  ;;  %1364 = vrot.lane.b32.xlu1 %v1329_v63, %s3625_s18  ;;  %v1665_v61 = vsel %vm508_vm1, %v1660_v35, %v1664_v52  ;;  %v3077_v3 = vcombine.low %v247_v23, %v4312_v16  ;;  %v664_v40 = vsel %vm508_vm1, %v659_v62, %v663_v10  ;;  %v675_v14 = vrot.slane %v673_v46, 1  ;;  %v2964_v35 = vld [vmem:[%s3671_s16 + $0x9c] sm:$0xe] }
  0xc8   : > { %v2125_v2 = vsel %vm2117_vm10, %v2090_v29, %v1859_v1  ;;  %v671_v0 = vor.u32 %v670_v59, %v666_v56  ;;  %v1838_v31 = vsel %vm781_vm0, %v1836_v5, %v1837_v27  ;;  %v1839_v29 = vrot.slane %v3171_v28, 1  ;;  %v2992_v28 = vld [vmem:[%s3671_s16 + $0xa8] sm:$0xf] }
  0xc9   : > { %2169 = vst.msk [vmem:[#allocation2 + $0x10] sm:$0xff] %vm2166_vm11, %v2125_v2  ;;  %1362 = vrot.lane.b32.xlu0 %v1326_v25, %s3625_s18  ;;  %v4361_v30 = vpop.permute.xlu1 %711  ;;  %v2930_v25 = vld [vmem:[%s3671_s16 + $0xa8] sm:$0xf]  ;;  %v1840_v16 = vrot.slane %v4293_v39, 1  ;;  %v822_v22 = vrot.slane %v4356_v58, 1  ;;  %v819_v13 = vrot.slane %v4324_v8, 1 }
  0xca   : > { %v3093_v18 = vcombine.low %v2930_v25, %v4384_v4  ;;  %v676_v39 = vsel %vm508_vm1, %v671_v0, %v675_v14  ;;  %v821_v2 = vrot.slane %v3077_v3, 1  ;;  %v3575_v58 = vld [vmem:[%s3671_s16 + $0xa4] ss:$0 sps:$4 sm:$0x11]   ;;  %v2965_v8 = vld [vmem:[%s3671_s16 + $0xa8] sm:$0xe] }
  0xcb   : > { %v1861_v53 = vpop.permute.xlu0 %1860  ;;  %1476 = vrot.lane.b32.xlu1 %v4272_v17, %s3629_s26  ;;  %v246_v17 = vld [vmem:[%s3671_s16 + $0x90] sm:$0xe]  ;;  %v1841_v19 = vsel %vm781_vm0, %v1839_v29, %v1840_v16  ;;  %v3125_v11 = vcombine.low %v2965_v8, %v4384_v4  ;;  %v1174_v59 = vshll.u32 %v3575_v58, 16  ;;  %v1334_v14 = vrot.slane %v3574_v32, 1 }
  0xcc   : > { %v2128_v41 = vsel %vm2117_vm10, %v2092_v34, %v1861_v53  ;;  %v3076_v55 = vcombine.low %v246_v17, %v4288_v21  ;;  %v3092_v21 = vcombine.low %v2928_v48, %v4390_v49  ;;  %v1181_v26 = vshll.u32 %v3093_v18, 16  ;;  %v4450_v16 = vld [vmem:[%s3671_s16 + $0xbc] ss:$0 sps:$4 sm:$0x11]  }
  0xcd   : > { %2170 = vst.msk [vmem:[#allocation2 + $0x18] sm:$0xff] %vm2166_vm11, %v2128_v41  ;;  %1474 = vrot.lane.b32.xlu0 %v4284_v33, %s3629_s26  ;;  %v4378_v63 = vpop.permute.xlu1 %840  ;;  %v1179_v47 = vshrl.u32 %v3093_v18, 16  ;;  %v823_v52 = vsel %vm781_vm0, %v821_v2, %v822_v22  ;;  %v1186_v53 = vshll.u32 %v3574_v32, 16  ;;  %v2994_v41 = vld [vmem:[%s3671_s16 + $0xb4] sm:$0xf]  ;;  %v3124_v17 = vcombine.low %v2964_v35, %v4390_v49 }
  0xce   : > { %v818_v57 = vrot.slane %v3076_v55, 1  ;;  %v1169_v36 = vshll.u32 %v3092_v21, 16  ;;  %v1183_v34 = vrot.slane %v1181_v26, 1  ;;  %v1167_v62 = vshrl.u32 %v3092_v21, 16  ;;  %v214_v55 = vld [vmem:[%s3671_s16 + $0xa8] sm:$0xf] }
  0xcf   : > { %v4386_v33 = vpop.permute.xlu0 %838  ;;  %1748 = vrot.lane.b32.xlu1 %v1677_v44, %s3630_s27  ;;  %v4425_v44 = vld [vmem:[%s3671_s16 + $0xb8] sm:$0xf]  ;;  %v1188_v25 = vrot.slane %v1186_v53, 1  ;;  %v1333_v3 = vrot.slane %v3125_v11, 1  ;;  %v1331_v29 = vrot.slane %v3575_v58, 1  ;;  %v1896_v22 = vsel %vm1886_vm3, %v3836_v50, %v4338_v51 }
  0xd0   : > { %v2185_v9 = vld [vmem:[#allocation2 + $0x10] sm:$0xff]  ;;  %v820_v23 = vsel %vm781_vm0, %v818_v57, %v819_v13  ;;  %v1171_v56 = vrot.slane %v1169_v36, 1  ;;  %v4437_v5 = vcombine.low %v2994_v41, %v4425_v44  ;;  %v1184_v27 = vor.u32 %v1183_v34, %v1179_v47  ;;  %v4471_v50 = vld [vmem:[%s3671_s16 + $0xb8] sm:$0xf] }
  0xd1   : > { %1746 = vrot.lane.b32.xlu0 %v1665_v61, %s3630_s27  ;;  %3386 = vmatprep.mubr.msk.bf16.mxu0 %vm2166_vm11, %v2185_v9  ;;  %v4399_v43 = vpop.permute.xlu1 %952  ;;  %v4433_v61 = vld [vmem:[%s3671_s16 + $0xac] sm:$0xf]  ;;  %v1176_v9 = vrot.slane %v1174_v59, 1  ;;  %v1929_v57 = vsel %vm1919_vm4, %v1896_v22, %v4386_v33  ;;  %v1335_v58 = vsel %vm781_vm0, %v1333_v3, %v1334_v14  ;;  %v1698_v8 = vshll.u32 %v4450_v16, 16 }
  0xd2   : > { %v1172_v48 = vor.u32 %v1171_v56, %v1167_v62  ;;  %v4443_v49 = vcombine.low %v2992_v28, %v4433_v61  ;;  %v1189_v13 = vsel %vm508_vm1, %v1184_v27, %v1188_v25  ;;  %v1691_v47 = vshrl.u32 %v4437_v5, 16  ;;  %v4483_v34 = vld [vmem:[%s3671_s16 + $0xb0] ss:$0 sps:$4 sm:$0x11]   ;;  %v3028_v28 = vld [vmem:[%s3671_s16 + $0xa8] sm:$0xe] }
  0xd3   : > { %v4404_v1 = vpop.permute.xlu0 %950  ;;  %725 = vrot.lane.b32.xlu1 %v664_v40, %s3627_s20  ;;  %v4447_v40 = vld [vmem:[%s3671_s16 + $0xac] sm:$0xf] }
  0xd4   : > { %v2186_v45 = vld [vmem:[#allocation2 + $0x18] sm:$0xff]  ;;  %v4463_v2 = vcombine.low %v214_v55, %v4447_v40  ;;  %v1177_v32 = vsel %vm508_vm1, %v1172_v48, %v1176_v9  ;;  %v1681_v26 = vshll.u32 %v4443_v49, 16  ;;  %v1962_v51 = vsel %vm1952_vm5, %v1929_v57, %v4404_v1 }
  0xd5   : > { %1874 = vrot.lane.b32.xlu0 %v1838_v31, %s3631_s28  ;;  %3387 = vmatmul.mubr.msk.bf16.gmra.mrb[4].mxu0 %vm2166_vm11, %v2186_v45  ;;  %v4413_v42 = vpop.permute.xlu1 %1224  ;;  %v1330_v31 = vrot.slane %v3124_v17, 1  ;;  %v1693_v45 = vshll.u32 %v4437_v5, 16  ;;  %v1898_v1 = vsel %vm1886_vm3, %v3850_v60, %v4361_v30  ;;  %v1700_v17 = vrot.slane %v1698_v8, 1  ;;  %v4515_v55 = vld [vmem:[%s3671_s16 + $0xbc] ss:$0 sps:$4 sm:$0x11]  }
  0xd6   : > { %v1931_v41 = vsel %vm1919_vm4, %v1898_v1, %v4378_v63  ;;  %v1683_v56 = vrot.slane %v1681_v26, 1  ;;  %v685_v48 = vshll.u32 %v4483_v34, 16  ;;  %v4549_v1 = vld [vmem:[%s3671_s16 + $0xb8] sm:$0xf] }
  0xd7   : > { %v1223_v15 = vpop.permute.xlu0 %1222  ;;  %727 = vrot.lane.b32.xlu1 %v676_v39, %s3627_s20  ;;  %v4460_v39 = vld [vmem:[%s3671_s16 + $0xb0] ss:$0 sps:$4 sm:$0x11]   ;;  %v1332_v36 = vsel %vm781_vm0, %v1330_v31, %v1331_v29  ;;  %v1695_v35 = vrot.slane %v1693_v45, 1  ;;  %v1964_v60 = vsel %vm1952_vm5, %v1931_v41, %v4399_v43  ;;  %v678_v43 = vshrl.u32 %v4463_v2, 16 }
  0xd8   : > { %v1995_v33 = vsel %vm1985_vm6, %v1962_v51, %v1223_v15  ;;  %v680_v15 = vshll.u32 %v4463_v2, 16  ;;  %v1686_v59 = vshll.u32 %v4460_v39, 16  ;;  %v1997_v27 = vsel %vm1985_vm6, %v1964_v60, %v4413_v42  ;;  %v249_v51 = vld [vmem:[%s3671_s16 + $0xb4] sm:$0xe] }
  0xd9   : > { %1876 = vrot.lane.b32.xlu0 %v1841_v19, %s3631_s28  ;;  %v4427_v10 = vpop.permute.xlu1 %1352  ;;  %v216_v19 = vld [vmem:[%s3671_s16 + $0xb4] sm:$0xf]  ;;  %v1696_v25 = vor.u32 %v1695_v35, %v1691_v47  ;;  %v4542_v47 = vld [vmem:[%s3671_s16 + $0xc4] sm:$0xf]  ;;  %v248_v35 = vld [vmem:[%s3671_s16 + $0xa8] sm:$0xe]  ;;  %v3079_v41 = vcombine.low %v249_v51, %v4471_v50 }
  0xda   : > { %v4492_v11 = vcombine.low %v216_v19, %v4471_v50  ;;  %v2030_v9 = vsel %vm2018_vm7, %v1997_v27, %v4427_v10  ;;  %v682_v3 = vrot.slane %v680_v15, 1  ;;  %v1688_v29 = vrot.slane %v1686_v59, 1  ;;  %v2996_v51 = vld [vmem:[%s3671_s16 + $0xc0] sm:$0xf] }
  0xdb   : > { %v1351_v46 = vpop.permute.xlu0 %1350  ;;  %856 = vrot.lane.b32.xlu1 %v823_v52, %s3626_s19  ;;  %v1679_v52 = vshrl.u32 %v4443_v49, 16  ;;  %v3172_v10 = vcombine.low %v3028_v28, %v4433_v61  ;;  %v697_v19 = vshll.u32 %v4515_v55, 16  ;;  %v1846_v15 = vrot.slane %v4450_v16, 1 }
  0xdc   : > { %v2028_v53 = vsel %vm2018_vm7, %v1995_v33, %v1351_v46  ;;  %v692_v42 = vshll.u32 %v4492_v11, 16  ;;  %v683_v61 = vor.u32 %v682_v3, %v678_v43  ;;  %v2934_v33 = vld [vmem:[%s3671_s16 + $0xc0] sm:$0xf]  ;;  %v3078_v16 = vcombine.low %v248_v35, %v4447_v40  ;;  %v3590_v40 = vld [vmem:[%s3671_s16 + $0xc8] ss:$0 sps:$4 sm:$0x11]  }
  0xdd   : > { %854 = vrot.lane.b32.xlu0 %v820_v23, %s3626_s19  ;;  %v4440_v4 = vpop.permute.xlu1 %1464  ;;  %v1684_v31 = vor.u32 %v1683_v56, %v1679_v52  ;;  %v2932_v52 = vld [vmem:[%s3671_s16 + $0xb4] sm:$0xf]  ;;  %v3095_v56 = vcombine.low %v2934_v33, %v4542_v47  ;;  %v827_v27 = vrot.slane %v3079_v41, 1  ;;  %v825_v3 = vrot.slane %v4483_v34, 1 }
  0xde   : > { %v694_v26 = vrot.slane %v692_v42, 1  ;;  %v3094_v50 = vcombine.low %v2932_v52, %v4549_v1  ;;  %v824_v43 = vrot.slane %v3078_v16, 1  ;;  %v3591_v42 = vld [vmem:[%s3671_s16 + $0xbc] ss:$0 sps:$4 sm:$0x11]  }
  0xdf   : > { %v1463_v0 = vpop.permute.xlu0 %1462  ;;  %968 = vrot.lane.b32.xlu1 %v3093_v18, %s3624_s17 }
  0xe0   : > { %v2061_v23 = vsel %vm2051_vm8, %v2028_v53, %v1463_v0  ;;  %v2063_v0 = vsel %vm2051_vm8, %v2030_v9, %v4440_v4  ;;  %v1701_v4 = vsel %vm508_vm1, %v1696_v25, %v1700_v17  ;;  %v1205_v25 = vshll.u32 %v3095_v56, 16 }
  0xe1   : > { %966 = vrot.lane.b32.xlu0 %v3092_v21, %s3624_s17  ;;  %v1737_v18 = vpop.permute.xlu1 %1736  ;;  %v826_v34 = vsel %vm781_vm0, %v824_v43, %v825_v3 }
  0xe2   : > { %v2096_v45 = vsel %vm2084_vm9, %v2063_v0, %v1737_v18  ;;  %v690_v18 = vshrl.u32 %v4492_v11, 16  ;;  %v1193_v0 = vshll.u32 %v3094_v50, 16 }
  0xe3   : > { %v1735_v21 = vpop.permute.xlu0 %1734  ;;  %1240 = vrot.lane.b32.xlu1 %v1189_v13, %s3628_s23  ;;  %v3029_v13 = vld [vmem:[%s3671_s16 + $0xb4] sm:$0xe] }
  0xe4   : > { %v2094_v30 = vsel %vm2084_vm9, %v2061_v23, %v1735_v21  ;;  %v1689_v21 = vsel %vm508_vm1, %v1684_v31, %v1688_v29  ;;  %v3173_v8 = vcombine.low %v3029_v13, %v4425_v44  ;;  %v699_v23 = vrot.slane %v697_v19, 1  ;;  %v2967_v29 = vld [vmem:[%s3671_s16 + $0xc0] sm:$0xe] }
  0xe5   : > { %1238 = vrot.lane.b32.xlu0 %v1177_v32, %s3628_s23  ;;  %v4497_v62 = vpop.permute.xlu1 %713  ;;  %v687_v32 = vrot.slane %v685_v48, 1  ;;  %v1210_v13 = vshll.u32 %v3590_v40, 16 }
  0xe7   : > { %v1863_v46 = vpop.permute.xlu0 %1862  ;;  %1368 = vrot.lane.b32.xlu1 %v1335_v58, %s3625_s18  ;;  %v1842_v58 = vrot.slane %v3172_v10, 1  ;;  %v688_v44 = vsel %vm508_vm1, %v683_v61, %v687_v32  ;;  %v1191_v32 = vshrl.u32 %v3094_v50, 16  ;;  %v1195_v61 = vrot.slane %v1193_v0, 1 }
  0xe8   : > { %v2131_v63 = vsel %vm2117_vm10, %v2094_v30, %v1863_v46  ;;  %v1845_v30 = vrot.slane %v3173_v8, 1  ;;  %v1212_v33 = vrot.slane %v1210_v13, 1 }
  0xe9   : > { %2171 = vst.msk [vmem:[#allocation2 + $0x20] sm:$0xff] %vm2166_vm11, %v2131_v63  ;;  %1366 = vrot.lane.b32.xlu0 %v1332_v36, %s3625_s18  ;;  %v4520_v14 = vpop.permute.xlu1 %715  ;;  %v1843_v36 = vrot.slane %v4460_v39, 1  ;;  %v695_v39 = vor.u32 %v694_v26, %v690_v18  ;;  %v828_v63 = vrot.slane %v4515_v55, 1  ;;  %v2966_v55 = vld [vmem:[%s3671_s16 + $0xb4] sm:$0xe]  ;;  %v1198_v18 = vshll.u32 %v3591_v42, 16 }
  0xea   : > { %v1847_v9 = vsel %vm781_vm0, %v1845_v30, %v1846_v15  ;;  %v4586_v26 = vld [vmem:[%s3671_s16 + $0xd0] sm:$0xf]  ;;  %v1900_v30 = vsel %vm1886_vm3, %v3912_v20, %v4497_v62  ;;  %v1902_v3 = vsel %vm1886_vm3, %v3933_v37, %v4520_v14 }
  0xeb   : > { %v1865_v22 = vpop.permute.xlu0 %1864  ;;  %1480 = vrot.lane.b32.xlu1 %v4437_v5, %s3629_s26  ;;  %v1844_v60 = vsel %vm781_vm0, %v1842_v58, %v1843_v36  ;;  %v700_v28 = vsel %vm508_vm1, %v695_v39, %v699_v23  ;;  %v829_v10 = vsel %vm781_vm0, %v827_v27, %v828_v63  ;;  %v3127_v58 = vcombine.low %v2967_v29, %v4542_v47  ;;  %v4599_v39 = vld [vmem:[%s3671_s16 + $0xd4] ss:$0 sps:$4 sm:$0x11]  }
  0xec   : > { %v2134_v57 = vsel %vm2117_vm10, %v2096_v45, %v1865_v22  ;;  %v1203_v45 = vshrl.u32 %v3095_v56, 16  ;;  %v1207_v22 = vrot.slane %v1205_v25, 1  ;;  %v3126_v36 = vcombine.low %v2966_v55, %v4549_v1 }
  0xed   : > { %2172 = vst.msk [vmem:[#allocation2 + $0x28] sm:$0xff] %vm2166_vm11, %v2134_v57  ;;  %1478 = vrot.lane.b32.xlu0 %v4443_v49, %s3629_s26  ;;  %v4535_v5 = vpop.permute.xlu1 %844  ;;  %v2998_v57 = vld [vmem:[%s3671_s16 + $0xcc] sm:$0xf]  ;;  %v1200_v15 = vrot.slane %v1198_v18, 1  ;;  %v1339_v47 = vrot.slane %v3127_v58, 1  ;;  %v1340_v23 = vrot.slane %v3590_v40, 1 }
  0xee   : > { %v1208_v8 = vor.u32 %v1207_v22, %v1203_v45  ;;  %v3143_v35 = vcombine.low %v2998_v57, %v4586_v26  ;;  %v1336_v1 = vrot.slane %v3126_v36, 1  ;;  %v3031_v22 = vld [vmem:[%s3671_s16 + $0xcc] sm:$0xe]  ;;  %v3030_v57 = vld [vmem:[%s3671_s16 + $0xc0] sm:$0xe] }
  0xef   : > { %v4544_v49 = vpop.permute.xlu0 %842  ;;  %1752 = vrot.lane.b32.xlu1 %v1701_v4, %s3630_s27  ;;  %v1341_v62 = vsel %vm781_vm0, %v1339_v47, %v1340_v23  ;;  %v3175_v18 = vcombine.low %v3031_v22, %v4586_v26 }
  0xf0   : > { %v2187_v53 = vld [vmem:[#allocation2 + $0x20] sm:$0xff]  ;;  %v1213_v16 = vsel %vm508_vm1, %v1208_v8, %v1212_v33  ;;  %v1715_v43 = vshrl.u32 %v3143_v35, 16 }
  0xf1   : > { %1750 = vrot.lane.b32.xlu0 %v1689_v21, %s3630_s27  ;;  %3390 = vmatprep.mubr.msk.bf16.mxu0 %vm2166_vm11, %v2187_v53  ;;  %v4558_v59 = vpop.permute.xlu1 %956  ;;  %v4590_v21 = vld [vmem:[%s3671_s16 + $0xc4] sm:$0xf]  ;;  %v1196_v53 = vor.u32 %v1195_v61, %v1191_v32 }
  0xf2   : > { %v3142_v41 = vcombine.low %v2996_v51, %v4590_v21  ;;  %v3174_v36 = vcombine.low %v3030_v57, %v4590_v21 }
  0xf3   : > { %v4563_v46 = vpop.permute.xlu0 %954  ;;  %729 = vrot.lane.b32.xlu1 %v688_v44, %s3627_s20  ;;  %v1201_v63 = vsel %vm508_vm1, %v1196_v53, %v1200_v15  ;;  %v1851_v53 = vrot.slane %v3175_v18, 1 }
  0xf4   : > { %v2188_v17 = vld [vmem:[#allocation2 + $0x28] sm:$0xff]  ;;  %v1705_v25 = vshll.u32 %v3142_v41, 16  ;;  %v1703_v0 = vshrl.u32 %v3142_v41, 16  ;;  %v1848_v21 = vrot.slane %v3174_v36, 1 }
  0xf5   : > { %1878 = vrot.lane.b32.xlu0 %v1844_v60, %s3631_s28  ;;  %3391 = vmatmul.mubr.msk.bf16.gmra.mrb[8].mxu0 %vm2166_vm11, %v2188_v17  ;;  %v4571_v48 = vpop.permute.xlu1 %1228  ;;  %v1337_v60 = vrot.slane %v3591_v42, 1  ;;  %v1717_v17 = vshll.u32 %v3143_v35, 16 }
  0xf7   : > { %v1227_v31 = vpop.permute.xlu0 %1226  ;;  %731 = vrot.lane.b32.xlu1 %v700_v28, %s3627_s20  ;;  %v1933_v28 = vsel %vm1919_vm4, %v1900_v30, %v4544_v49  ;;  %v1722_v49 = vshll.u32 %v4599_v39, 16  ;;  %v1719_v42 = vrot.slane %v1717_v17, 1 }
  0xf8   : > { %v1966_v40 = vsel %vm1952_vm5, %v1933_v28, %v4563_v46 }
  0xf9   : > { %1880 = vrot.lane.b32.xlu0 %v1847_v9, %s3631_s28  ;;  %v4582_v4 = vpop.permute.xlu1 %1356  ;;  %v1999_v20 = vsel %vm1985_vm6, %v1966_v40, %v1227_v31  ;;  %v1935_v31 = vsel %vm1919_vm4, %v1902_v3, %v4535_v5  ;;  %v1720_v61 = vor.u32 %v1719_v42, %v1715_v43 }
  0xfa   : > { %v1968_v13 = vsel %vm1952_vm5, %v1935_v31, %v4558_v59  ;;  %v1724_v59 = vrot.slane %v1722_v49, 1 }
  0xfb   : > { %v1355_v19 = vpop.permute.xlu0 %1354  ;;  %860 = vrot.lane.b32.xlu1 %v829_v10, %s3626_s19  ;;  %v1707_v10 = vrot.slane %v1705_v25, 1 }
  0xfc   : > { %v2032_v46 = vsel %vm2018_vm7, %v1999_v20, %v1355_v19  ;;  %v1725_v26 = vsel %vm508_vm1, %v1720_v61, %v1724_v59 }
  0xfd   : > { %858 = vrot.lane.b32.xlu0 %v826_v34, %s3626_s19  ;;  %v1469_v52 = vpop.permute.xlu1 %1468  ;;  %v2001_v34 = vsel %vm1985_vm6, %v1968_v13, %v4571_v48  ;;  %v1708_v58 = vor.u32 %v1707_v10, %v1703_v0 }
  0xfe   : > { %v2034_v5 = vsel %vm2018_vm7, %v2001_v34, %v4582_v4 }
  0xff   : > { %v1467_v44 = vpop.permute.xlu0 %1466  ;;  %972 = vrot.lane.b32.xlu1 %v3095_v56, %s3624_s17  ;;  %v3595_v56 = vld [vmem:[%s3671_s16 + $0xc8] ss:$0 sps:$4 sm:$0x11]   ;;  %v2067_v19 = vsel %vm2051_vm8, %v2034_v5, %v1469_v52  ;;  %v1852_v52 = vrot.slane %v4599_v39, 1 }
 0x100   : > { %v2065_v29 = vsel %vm2051_vm8, %v2032_v46, %v1467_v44  ;;  %v1710_v45 = vshll.u32 %v3595_v56, 16  ;;  %v1849_v47 = vrot.slane %v3595_v56, 1 }
 0x101   : > { %970 = vrot.lane.b32.xlu0 %v3094_v50, %s3624_s17  ;;  %v1741_v27 = vpop.permute.xlu1 %1740  ;;  %v1338_v50 = vsel %vm781_vm0, %v1336_v1, %v1337_v60 }
 0x102   : > { %v1712_v48 = vrot.slane %v1710_v45, 1  ;;  %v2100_v8 = vsel %vm2084_vm9, %v2067_v19, %v1741_v27  ;;  %v1850_v60 = vsel %vm781_vm0, %v1848_v21, %v1849_v47 }
 0x103   : > { %v1739_v9 = vpop.permute.xlu0 %1738  ;;  %1244 = vrot.lane.b32.xlu1 %v1213_v16, %s3628_s23 }
 0x104   : > { %v2098_v37 = vsel %vm2084_vm9, %v2065_v29, %v1739_v9  ;;  %v1713_v44 = vsel %vm508_vm1, %v1708_v58, %v1712_v48 }
 0x105   : > { %1242 = vrot.lane.b32.xlu0 %v1201_v63, %s3628_s23  ;;  %v718_v55 = vpop.permute.xlu1 %717 }
 0x106   : > { %v1904_v25 = vsel %vm1886_vm3, %v4011_v6, %v718_v55 }
 0x107   : > { %v1867_v14 = vpop.permute.xlu0 %1866  ;;  %1372 = vrot.lane.b32.xlu1 %v1341_v62, %s3625_s18 }
 0x108   : > { %v2137_v32 = vsel %vm2117_vm10, %v2098_v37, %v1867_v14 }
 0x109   : > { %2173 = vst.msk [vmem:[#allocation2 + $0x30] sm:$0xff] %vm2166_vm11, %v2137_v32  ;;  %1370 = vrot.lane.b32.xlu0 %v1338_v50, %s3625_s18  ;;  %v720_v51 = vpop.permute.xlu1 %719 }
 0x10a   : > { %v1906_v50 = vsel %vm1886_vm3, %v4028_v24, %v720_v51 }
 0x10b   : > { %v1869_v33 = vpop.permute.xlu0 %1868  ;;  %1484 = vrot.lane.b32.xlu1 %v3143_v35, %s3629_s26  ;;  %v1853_v35 = vsel %vm781_vm0, %v1851_v53, %v1852_v52 }
 0x10c   : > { %v2140_v4 = vsel %vm2117_vm10, %v2100_v8, %v1869_v33 }
 0x10d   : > { %2174 = vst.msk [vmem:[#allocation2 + $0x38] sm:$0xff] %vm2166_vm11, %v2140_v4  ;;  %1482 = vrot.lane.b32.xlu0 %v3142_v41, %s3629_s26  ;;  %v849_v15 = vpop.permute.xlu1 %848 }
 0x10e   : > { %v1939_v3 = vsel %vm1919_vm4, %v1906_v50, %v849_v15 }
 0x10f   : > { %v847_v23 = vpop.permute.xlu0 %846  ;;  %1756 = vrot.lane.b32.xlu1 %v1725_v26, %s3630_s27 }
 0x110   : > { %v2189_v1 = vld [vmem:[#allocation2 + $0x30] sm:$0xff]  ;;  %v1937_v40 = vsel %vm1919_vm4, %v1904_v25, %v847_v23 }
 0x111   : > { %1754 = vrot.lane.b32.xlu0 %v1713_v44, %s3630_s27  ;;  %3394 = vmatprep.mubr.msk.bf16.mxu0 %vm2166_vm11, %v2189_v1  ;;  %v961_v41 = vpop.permute.xlu1 %960 }
 0x112   : > { %v1972_v6 = vsel %vm1952_vm5, %v1939_v3, %v961_v41 }
 0x113   : > { %v959_v30 = vpop.permute.xlu0 %958  ;;  %1884 = vrot.lane.b32.xlu1 %v1853_v35, %s3631_s28 }
 0x114   : > { %v2190_v39 = vld [vmem:[#allocation2 + $0x38] sm:$0xff]  ;;  %v1970_v43 = vsel %vm1952_vm5, %v1937_v40, %v959_v30 }
 0x115   : > { %1882 = vrot.lane.b32.xlu0 %v1850_v60, %s3631_s28  ;;  %3395 = vmatmul.mubr.msk.bf16.gmra.mrb[12].mxu0 %vm2166_vm11, %v2190_v39  ;;  %v1233_v16 = vpop.permute.xlu1 %1232 }
 0x116   : > { %v2005_v29 = vsel %vm1985_vm6, %v1972_v6, %v1233_v16 }
 0x117   : > { %v1231_v17 = vpop.permute.xlu0 %1230 }
 0x118   : > { %v2003_v62 = vsel %vm1985_vm6, %v1970_v43, %v1231_v17 }
 0x119   : > { %v1361_v28 = vpop.permute.xlu1 %1360 }
 0x11a   : > { %v2038_v10 = vsel %vm2018_vm7, %v2005_v29, %v1361_v28 }
 0x11b   : > { %v1359_v27 = vpop.permute.xlu0 %1358 }
 0x11c   : > { %v2036_v49 = vsel %vm2018_vm7, %v2003_v62, %v1359_v27 }
 0x11d   : > { %v1473_v63 = vpop.permute.xlu1 %1472 }
 0x11e   : > { %v2071_v24 = vsel %vm2051_vm8, %v2038_v10, %v1473_v63 }
 0x11f   : > { %v1471_v56 = vpop.permute.xlu0 %1470 }
 0x120   : > { %v2069_v46 = vsel %vm2051_vm8, %v2036_v49, %v1471_v56 }
 0x121   : > { %v1745_v9 = vpop.permute.xlu1 %1744 }
 0x122   : > { %v2104_v22 = vsel %vm2084_vm9, %v2071_v24, %v1745_v9 }
 0x123   : > { %v1743_v20 = vpop.permute.xlu0 %1742 }
 0x124   : > { %v2102_v0 = vsel %vm2084_vm9, %v2069_v46, %v1743_v20 }
 0x125   : > { %v722_v42 = vpop.permute.xlu1 %721 }
 0x126   : > { %v1908_v36 = vsel %vm1886_vm3, %v4154_v7, %v722_v42 }
 0x127   : > { %v1871_v31 = vpop.permute.xlu0 %1870 }
 0x128   : > { %v2143_v55 = vsel %vm2117_vm10, %v2102_v0, %v1871_v31 }
 0x129   : > { %2175 = vst.msk [vmem:[#allocation2 + $0x40] sm:$0xff] %vm2166_vm11, %v2143_v55  ;;  %v724_v45 = vpop.permute.xlu1 %723 }
 0x12a   : > { %v1910_v52 = vsel %vm1886_vm3, %v4178_v38, %v724_v45 }
 0x12b   : > { %v1873_v13 = vpop.permute.xlu0 %1872 }
 0x12c   : > { %v2146_v37 = vsel %vm2117_vm10, %v2104_v22, %v1873_v13 }
 0x12d   : > { %2176 = vst.msk [vmem:[#allocation2 + $0x48] sm:$0xff] %vm2166_vm11, %v2146_v37  ;;  %v853_v14 = vpop.permute.xlu1 %852 }
 0x12e   : > { %v1943_v44 = vsel %vm1919_vm4, %v1910_v52, %v853_v14 }
 0x12f   : > { %v851_v57 = vpop.permute.xlu0 %850 }
 0x130   : > { %v2191_v34 = vld [vmem:[#allocation2 + $0x40] sm:$0xff]  ;;  %v1941_v8 = vsel %vm1919_vm4, %v1908_v36, %v851_v57 }
 0x131   : > { %3398 = vmatprep.mubr.msk.bf16.mxu1 %vm2166_vm11, %v2191_v34  ;;  %v965_v32 = vpop.permute.xlu1 %964 }
 0x132   : > { %v1976_v7 = vsel %vm1952_vm5, %v1943_v44, %v965_v32 }
 0x133   : > { %v963_v5 = vpop.permute.xlu0 %962 }
 0x134   : > { %v2192_v61 = vld [vmem:[#allocation2 + $0x48] sm:$0xff]  ;;  %v1974_v4 = vsel %vm1952_vm5, %v1941_v8, %v963_v5 }
 0x135   : > { %3399 = vmatmul.mubr.msk.bf16.vlgmr.msra.gmra.mrb[0].mxu1 %vm2166_vm11, %v2192_v61  ;;  %v1237_v59 = vpop.permute.xlu1 %1236 }
 0x136   : > { %v2009_v35 = vsel %vm1985_vm6, %v1976_v7, %v1237_v59 }
 0x137   : > { %v1235_v18 = vpop.permute.xlu0 %1234 }
 0x138   : > { %v2007_v53 = vsel %vm1985_vm6, %v1974_v4, %v1235_v18 }
 0x139   : > { %v1365_v19 = vpop.permute.xlu1 %1364 }
 0x13a   : > { %v2042_v60 = vsel %vm2018_vm7, %v2009_v35, %v1365_v19 }
 0x13b   : > { %v1363_v51 = vpop.permute.xlu0 %1362 }
 0x13c   : > { %v2040_v15 = vsel %vm2018_vm7, %v2007_v53, %v1363_v51 }
 0x13d   : > { %v1477_v58 = vpop.permute.xlu1 %1476 }
 0x13e   : > { %v2075_v38 = vsel %vm2051_vm8, %v2042_v60, %v1477_v58 }
 0x13f   : > { %v1475_v48 = vpop.permute.xlu0 %1474 }
 0x140   : > { %v2073_v21 = vsel %vm2051_vm8, %v2040_v15, %v1475_v48 }
 0x141   : > { %v1749_v33 = vpop.permute.xlu1 %1748 }
 0x142   : > { %v2108_v39 = vsel %vm2084_vm9, %v2075_v38, %v1749_v33 }
 0x143   : > { %v1747_v26 = vpop.permute.xlu0 %1746 }
 0x144   : > { %v2106_v23 = vsel %vm2084_vm9, %v2073_v21, %v1747_v26 }
 0x145   : > { %v726_v47 = vpop.permute.xlu1 %725 }
 0x146   : > { %v1912_v3 = vsel %vm1886_vm3, %v4304_v54, %v726_v47 }
 0x147   : > { %v1875_v1 = vpop.permute.xlu0 %1874 }
 0x148   : > { %v2149_v41 = vsel %vm2117_vm10, %v2106_v23, %v1875_v1 }
 0x149   : > { %2177 = vst.msk [vmem:[#allocation2 + $0x50] sm:$0xff] %vm2166_vm11, %v2149_v41  ;;  %v728_v30 = vpop.permute.xlu1 %727 }
 0x14a   : > { %v1914_v29 = vsel %vm1886_vm3, %v4333_v12, %v728_v30 }
 0x14b   : > { %v1877_v16 = vpop.permute.xlu0 %1876 }
 0x14c   : > { %v2152_v17 = vsel %vm2117_vm10, %v2108_v39, %v1877_v16 }
 0x14d   : > { %2178 = vst.msk [vmem:[#allocation2 + $0x58] sm:$0xff] %vm2166_vm11, %v2152_v17  ;;  %v857_v28 = vpop.permute.xlu1 %856 }
 0x14e   : > { %v1947_v10 = vsel %vm1919_vm4, %v1914_v29, %v857_v28 }
 0x14f   : > { %v855_v27 = vpop.permute.xlu0 %854 }
 0x150   : > { %v2193_v63 = vld [vmem:[#allocation2 + $0x50] sm:$0xff]  ;;  %v1945_v46 = vsel %vm1919_vm4, %v1912_v3, %v855_v27 }
 0x151   : > { %3402 = vmatprep.mubr.msk.bf16.mxu1 %vm2166_vm11, %v2193_v63  ;;  %v969_v56 = vpop.permute.xlu1 %968 }
 0x152   : > { %v1980_v54 = vsel %vm1952_vm5, %v1947_v10, %v969_v56 }
 0x153   : > { %v967_v25 = vpop.permute.xlu0 %966 }
 0x154   : > { %v2194_v40 = vld [vmem:[#allocation2 + $0x58] sm:$0xff]  ;;  %v1978_v6 = vsel %vm1952_vm5, %v1945_v46, %v967_v25 }
 0x155   : > { %3403 = vmatmul.mubr.msk.bf16.gmra.mrb[4].mxu1 %vm2166_vm11, %v2194_v40  ;;  %v1241_v9 = vpop.permute.xlu1 %1240 }
 0x156   : > { %v2013_v37 = vsel %vm1985_vm6, %v1980_v54, %v1241_v9 }
 0x157   : > { %v1239_v43 = vpop.permute.xlu0 %1238 }
 0x158   : > { %v2011_v31 = vsel %vm1985_vm6, %v1978_v6, %v1239_v43 }
 0x159   : > { %v1369_v20 = vpop.permute.xlu1 %1368 }
 0x15a   : > { %v2046_v57 = vsel %vm2018_vm7, %v2013_v37, %v1369_v20 }
 0x15b   : > { %v1367_v62 = vpop.permute.xlu0 %1366 }
 0x15c   : > { %v2044_v55 = vsel %vm2018_vm7, %v2011_v31, %v1367_v62 }
 0x15d   : > { %v1481_v50 = vpop.permute.xlu1 %1480 }
 0x15e   : > { %v2079_v12 = vsel %vm2051_vm8, %v2046_v57, %v1481_v50 }
 0x15f   : > { %v1479_v49 = vpop.permute.xlu0 %1478 }
 0x160   : > { %v2077_v24 = vsel %vm2051_vm8, %v2044_v55, %v1479_v49 }
 0x161   : > { %v1753_v42 = vpop.permute.xlu1 %1752 }
 0x162   : > { %v2112_v32 = vsel %vm2084_vm9, %v2079_v12, %v1753_v42 }
 0x163   : > { %v1751_v0 = vpop.permute.xlu0 %1750 }
 0x164   : > { %v2110_v22 = vsel %vm2084_vm9, %v2077_v24, %v1751_v0 }
 0x165   : > { %v730_v45 = vpop.permute.xlu1 %729 }
 0x166   : > { %v1916_v15 = vsel %vm1886_vm3, %v4463_v2, %v730_v45 }
 0x167   : > { %v1879_v13 = vpop.permute.xlu0 %1878 }
 0x168   : > { %v2155_v14 = vsel %vm2117_vm10, %v2110_v22, %v1879_v13 }
 0x169   : > { %2179 = vst.msk [vmem:[#allocation2 + $0x60] sm:$0xff] %vm2166_vm11, %v2155_v14  ;;  %v732_v34 = vpop.permute.xlu1 %731 }
 0x16a   : > { %v1918_v52 = vsel %vm1886_vm3, %v4492_v11, %v732_v34 }
 0x16b   : > { %v1881_v5 = vpop.permute.xlu0 %1880 }
 0x16c   : > { %v2158_v61 = vsel %vm2117_vm10, %v2112_v32, %v1881_v5 }
 0x16d   : > { %2180 = vst.msk [vmem:[#allocation2 + $0x68] sm:$0xff] %vm2166_vm11, %v2158_v61  ;;  %v861_v59 = vpop.permute.xlu1 %860 }
 0x16e   : > { %v1951_v44 = vsel %vm1919_vm4, %v1918_v52, %v861_v59 }
 0x16f   : > { %v859_v18 = vpop.permute.xlu0 %858 }
 0x170   : > { %v2195_v19 = vld [vmem:[#allocation2 + $0x60] sm:$0xff]  ;;  %v1949_v21 = vsel %vm1919_vm4, %v1916_v15, %v859_v18 }
 0x171   : > { %3406 = vmatprep.mubr.msk.bf16.mxu1 %vm2166_vm11, %v2195_v19  ;;  %v973_v51 = vpop.permute.xlu1 %972 }
 0x172   : > { %v1984_v47 = vsel %vm1952_vm5, %v1951_v44, %v973_v51 }
 0x173   : > { %v971_v58 = vpop.permute.xlu0 %970 }
 0x174   : > { %v2196_v48 = vld [vmem:[#allocation2 + $0x68] sm:$0xff]  ;;  %v1982_v23 = vsel %vm1952_vm5, %v1949_v21, %v971_v58 }
 0x175   : > { %3407 = vmatmul.mubr.msk.bf16.gmra.mrb[8].mxu1 %vm2166_vm11, %v2196_v48  ;;  %v1245_v36 = vpop.permute.xlu1 %1244 }
 0x176   : > { %v2017_v1 = vsel %vm1985_vm6, %v1984_v47, %v1245_v36 }
 0x177   : > { %v1243_v8 = vpop.permute.xlu0 %1242 }
 0x178   : > { %v2015_v41 = vsel %vm1985_vm6, %v1982_v23, %v1243_v8 }
 0x179   : > { %v1373_v33 = vpop.permute.xlu1 %1372 }
 0x17a   : > { %v2050_v60 = vsel %vm2018_vm7, %v2017_v1, %v1373_v33 }
 0x17b   : > { %v1371_v4 = vpop.permute.xlu0 %1370 }
 0x17c   : > { %v2048_v11 = vsel %vm2018_vm7, %v2015_v41, %v1371_v4 }
 0x17d   : > { %v1485_v26 = vpop.permute.xlu1 %1484 }
 0x17e   : > { %v2083_v2 = vsel %vm2051_vm8, %v2050_v60, %v1485_v26 }
 0x17f   : > { %v1483_v53 = vpop.permute.xlu0 %1482 }
 0x180   : > { %v2081_v38 = vsel %vm2051_vm8, %v2048_v11, %v1483_v53 }
 0x181   : > { %v1757_v7 = vpop.permute.xlu1 %1756 }
 0x182   : > { %v2116_v30 = vsel %vm2084_vm9, %v2083_v2, %v1757_v7 }
 0x183   : > { %v1755_v35 = vpop.permute.xlu0 %1754 }
 0x184   : > { %v2114_v16 = vsel %vm2084_vm9, %v2081_v38, %v1755_v35 }
 0x185   : > { %v1885_v39 = vpop.permute.xlu1 %1884 }
 0x186   : > { %v2164_v17 = vsel %vm2117_vm10, %v2116_v30, %v1885_v39 }
 0x187   : > { %v1883_v28 = vpop.permute.xlu0 %1882  ;;  %2182 = vst.msk [vmem:[#allocation2 + $0x78] sm:$0xff] %vm2166_vm11, %v2164_v17 }
 0x188   : > { %v2161_v27 = vsel %vm2117_vm10, %v2114_v16, %v1883_v28  ;;  %v4743_v63 = vpop.f32.mrb[0].mxu0 }
 0x189   : > { %2181 = vst.msk [vmem:[#allocation2 + $0x70] sm:$0xff] %vm2166_vm11, %v2161_v27  ;;  %v4746_v56 = vpop.f32.mrb[1].mxu0  ;;  %v2472_v62 = vmul.f32 %v4743_v63, %v4743_v63 }
 0x18a   : > { %v4748_v25 = vpop.f32.mrb[2].mxu0  ;;  %v2470_v9 = vmul.f32 %v4746_v56, %v4746_v56 }
 0x18b   : > { %v4750_v40 = vpop.f32.mrb[3].mxu0  ;;  %v2473_v46 = vmul.f32 %v4748_v25, %v4748_v25 }
 0x18c   : > { %v2433_v43 = vadd.f32 %v4750_v40, %v4746_v56  ;;  %v2471_v20 = vmul.f32 %v4750_v40, %v4750_v40 }
 0x18e   : > { %v2434_v50 = vadd.f32 %v4743_v63, %v2433_v43  ;;  %v2502_v49 = vadd.f32 %v2471_v20, %v2470_v9  ;;  %v2198_v3 = vld [vmem:[#allocation2 + $0x78] sm:$0xff] }
 0x190   : > { %v2503_v42 = vadd.f32 %v2502_v49, %v2472_v62  ;;  %v2197_v6 = vld [vmem:[#allocation2 + $0x70] sm:$0xff]  ;;  %v2435_v0 = vadd.f32 %v4748_v25, %v2434_v50 }
 0x191   : > { %3410 = vmatprep.mubr.msk.bf16.mxu1 %vm2166_vm11, %v2197_v6 }
 0x192   : > { %3411 = vmatmul.mubr.msk.bf16.gmra.mrb[12].mxu1 %vm2166_vm11, %v2198_v3  ;;  %v2504_v31 = vadd.f32 %v2503_v42, %v2473_v46 }
 0x1a8   : > { %v4766_v29 = vpop.f32.mrb[4].mxu0 }
 0x1a9   : > { %v4768_v55 = vpop.f32.mrb[5].mxu0  ;;  %v2476_v14 = vmul.f32 %v4766_v29, %v4766_v29 }
 0x1aa   : > { %v2436_v10 = vadd.f32 %v2435_v0, %v4768_v55  ;;  %v2474_v24 = vmul.f32 %v4768_v55, %v4768_v55  ;;  %v4773_v45 = vpop.f32.mrb[6].mxu0 }
 0x1ab   : > { %v4775_v54 = vpop.f32.mrb[7].mxu0  ;;  %v2477_v34 = vmul.f32 %v4773_v45, %v4773_v45 }
 0x1ac   : > { %v2505_v22 = vadd.f32 %v2504_v31, %v2474_v24  ;;  %v2437_v13 = vadd.f32 %v2436_v10, %v4775_v54  ;;  %v2475_v37 = vmul.f32 %v4775_v54, %v4775_v54 }
 0x1ae   : > { %v2438_v57 = vadd.f32 %v4766_v29, %v2437_v13  ;;  %v2506_v12 = vadd.f32 %v2505_v22, %v2475_v37 }
 0x1b0   : > { %v2507_v32 = vadd.f32 %v2506_v12, %v2476_v14  ;;  %v2439_v5 = vadd.f32 %v4773_v45, %v2438_v57 }
 0x1b2   : > { %v2508_v61 = vadd.f32 %v2507_v32, %v2477_v34 }
 0x1c8   : > { %v4786_v59 = vpop.f32.mrb[8].mxu0 }
 0x1c9   : > { %v4788_v18 = vpop.f32.mrb[9].mxu0  ;;  %v2480_v4 = vmul.f32 %v4786_v59, %v4786_v59 }
 0x1ca   : > { %v2440_v19 = vadd.f32 %v2439_v5, %v4788_v18  ;;  %v2478_v51 = vmul.f32 %v4788_v18, %v4788_v18  ;;  %v4793_v58 = vpop.f32.mrb[10].mxu0 }
 0x1cb   : > { %v4795_v48 = vpop.f32.mrb[11].mxu0  ;;  %v2481_v52 = vmul.f32 %v4793_v58, %v4793_v58 }
 0x1cc   : > { %v2509_v36 = vadd.f32 %v2508_v61, %v2478_v51  ;;  %v2441_v8 = vadd.f32 %v2440_v19, %v4795_v48  ;;  %v2479_v33 = vmul.f32 %v4795_v48, %v4795_v48 }
 0x1ce   : > { %v2442_v26 = vadd.f32 %v4786_v59, %v2441_v8  ;;  %v2510_v53 = vadd.f32 %v2509_v36, %v2479_v33 }
 0x1d0   : > { %v2511_v15 = vadd.f32 %v2510_v53, %v2480_v4  ;;  %v2443_v44 = vadd.f32 %v4793_v58, %v2442_v26 }
 0x1d2   : > { %v2512_v21 = vadd.f32 %v2511_v15, %v2481_v52 }
 0x1e8   : > { %v4806_v47 = vpop.f32.mrb[12].mxu0 }
 0x1e9   : > { %v4808_v7 = vpop.f32.mrb[13].mxu0  ;;  %v2484_v38 = vmul.f32 %v4806_v47, %v4806_v47 }
 0x1ea   : > { %v2444_v23 = vadd.f32 %v2443_v44, %v4808_v7  ;;  %v2482_v1 = vmul.f32 %v4808_v7, %v4808_v7  ;;  %v4813_v35 = vpop.f32.mrb[14].mxu0 }
 0x1eb   : > { %v4815_v41 = vpop.f32.mrb[15].mxu0  ;;  %v2485_v16 = vmul.f32 %v4813_v35, %v4813_v35 }
 0x1ec   : > { %v2513_v60 = vadd.f32 %v2512_v21, %v2482_v1  ;;  %v2445_v11 = vadd.f32 %v2444_v23, %v4815_v41  ;;  %v2483_v2 = vmul.f32 %v4815_v41, %v4815_v41 }
 0x1ee   : > { %v2446_v30 = vadd.f32 %v4806_v47, %v2445_v11  ;;  %v2514_v39 = vadd.f32 %v2513_v60, %v2483_v2 }
 0x1f0   : > { %v2515_v17 = vadd.f32 %v2514_v39, %v2484_v38  ;;  %v2447_v28 = vadd.f32 %v4813_v35, %v2446_v30 }
 0x1f2   : > { %v2516_v27 = vadd.f32 %v2515_v17, %v2485_v16 }
 0x208   : > { %v4826_v9 = vpop.f32.mrb[0].mxu1 }
 0x209   : > { %v4828_v43 = vpop.f32.mrb[1].mxu1  ;;  %v2488_v6 = vmul.f32 %v4826_v9, %v4826_v9 }
 0x20a   : > { %v2448_v20 = vadd.f32 %v2447_v28, %v4828_v43  ;;  %v2486_v62 = vmul.f32 %v4828_v43, %v4828_v43  ;;  %v4833_v50 = vpop.f32.mrb[2].mxu1 }
 0x20b   : > { %v4835_v49 = vpop.f32.mrb[3].mxu1  ;;  %v2489_v10 = vmul.f32 %v4833_v50, %v4833_v50 }
 0x20c   : > { %v2517_v3 = vadd.f32 %v2516_v27, %v2486_v62  ;;  %v2449_v46 = vadd.f32 %v2448_v20, %v4835_v49  ;;  %v2487_v42 = vmul.f32 %v4835_v49, %v4835_v49 }
 0x20e   : > { %v2450_v0 = vadd.f32 %v4826_v9, %v2449_v46  ;;  %v2518_v31 = vadd.f32 %v2517_v3, %v2487_v42 }
 0x210   : > { %v2519_v24 = vadd.f32 %v2518_v31, %v2488_v6  ;;  %v2451_v22 = vadd.f32 %v4833_v50, %v2450_v0 }
 0x212   : > { %v2520_v13 = vadd.f32 %v2519_v24, %v2489_v10 }
 0x228   : > { %v4846_v37 = vpop.f32.mrb[4].mxu1 }
 0x229   : > { %v4848_v14 = vpop.f32.mrb[5].mxu1  ;;  %v2492_v51 = vmul.f32 %v4846_v37, %v4846_v37 }
 0x22a   : > { %v2452_v57 = vadd.f32 %v2451_v22, %v4848_v14  ;;  %v2490_v12 = vmul.f32 %v4848_v14, %v4848_v14  ;;  %v4853_v34 = vpop.f32.mrb[6].mxu1 }
 0x22b   : > { %v4855_v32 = vpop.f32.mrb[7].mxu1  ;;  %v2493_v33 = vmul.f32 %v4853_v34, %v4853_v34 }
 0x22c   : > { %v2521_v5 = vadd.f32 %v2520_v13, %v2490_v12  ;;  %v2453_v61 = vadd.f32 %v2452_v57, %v4855_v32  ;;  %v2491_v19 = vmul.f32 %v4855_v32, %v4855_v32 }
 0x22e   : > { %v2454_v36 = vadd.f32 %v4846_v37, %v2453_v61  ;;  %v2522_v8 = vadd.f32 %v2521_v5, %v2491_v19 }
 0x230   : > { %v2523_v4 = vadd.f32 %v2522_v8, %v2492_v51  ;;  %v2455_v26 = vadd.f32 %v4853_v34, %v2454_v36 }
 0x232   : > { %v2524_v53 = vadd.f32 %v2523_v4, %v2493_v33 }
 0x248   : > { %v4866_v52 = vpop.f32.mrb[8].mxu1 }
 0x249   : > { %v4868_v15 = vpop.f32.mrb[9].mxu1  ;;  %v2496_v38 = vmul.f32 %v4866_v52, %v4866_v52 }
 0x24a   : > { %v2456_v44 = vadd.f32 %v2455_v26, %v4868_v15  ;;  %v2494_v21 = vmul.f32 %v4868_v15, %v4868_v15  ;;  %v4873_v23 = vpop.f32.mrb[10].mxu1 }
 0x24b   : > { %v4875_v1 = vpop.f32.mrb[11].mxu1  ;;  %v2497_v16 = vmul.f32 %v4873_v23, %v4873_v23 }
 0x24c   : > { %v2525_v60 = vadd.f32 %v2524_v53, %v2494_v21  ;;  %v2457_v11 = vadd.f32 %v2456_v44, %v4875_v1  ;;  %v2495_v2 = vmul.f32 %v4875_v1, %v4875_v1 }
 0x24e   : > { %v2458_v30 = vadd.f32 %v4866_v52, %v2457_v11  ;;  %v2526_v39 = vadd.f32 %v2525_v60, %v2495_v2 }
 0x250   : > { %v2527_v17 = vadd.f32 %v2526_v39, %v2496_v38  ;;  %v2459_v28 = vadd.f32 %v4873_v23, %v2458_v30 }
 0x252   : > { %v2528_v27 = vadd.f32 %v2527_v17, %v2497_v16 }
 0x265   : > { %v4886_v20 = vpop.f32.mrb[12].mxu1 }
 0x266   : > { %v4888_v62 = vpop.f32.mrb[13].mxu1  ;;  %v2500_v24 = vmul.f32 %v4886_v20, %v4886_v20 }
 0x267   : > { %v2460_v3 = vadd.f32 %v2459_v28, %v4888_v62  ;;  %v2498_v46 = vmul.f32 %v4888_v62, %v4888_v62  ;;  %v4893_v42 = vpop.f32.mrb[14].mxu1 }
 0x268   : > { %v4895_v6 = vpop.f32.mrb[15].mxu1  ;;  %v2501_v57 = vmul.f32 %v4893_v42, %v4893_v42 }
 0x269   : > { %v2529_v0 = vadd.f32 %v2528_v27, %v2498_v46  ;;  %v2461_v31 = vadd.f32 %v2460_v3, %v4895_v6  ;;  %v2499_v10 = vmul.f32 %v4895_v6, %v4895_v6 }
 0x26b   : > { %v2462_v22 = vadd.f32 %v4886_v20, %v2461_v31  ;;  %v2530_v13 = vadd.f32 %v2529_v0, %v2499_v10 }
 0x26d   : > { %v2463_v12 = vadd.f32 %v4893_v42, %v2462_v22  ;;  %v2531_v5 = vadd.f32 %v2530_v13, %v2500_v24 }
 0x26f   : > { %v2464_v61 = vrot.slane %v2463_v12, 4  ;;  %v2532_v19 = vadd.f32 %v2531_v5, %v2501_v57 }
 0x271   : > { %v2465_v51 = vadd.f32 %v2464_v61, %v2463_v12  ;;  %v2533_v36 = vrot.slane %v2532_v19, 4 }
 0x273   : > { %v2466_v8 = vrot.slane %v2465_v51, 2  ;;  %v2534_v33 = vadd.f32 %v2533_v36, %v2532_v19 }
 0x275   : > { %v2467_v4 = vadd.f32 %v2466_v8, %v2465_v51  ;;  %v2535_v26 = vrot.slane %v2534_v33, 2 }
 0x277   : > { %v2468_v53 = vrot.slane %v2467_v4, 1  ;;  %v2536_v44 = vadd.f32 %v2535_v26, %v2534_v33 }
 0x279   : > { %v2469_v21 = vadd.f32 %v2468_v53, %v2467_v4  ;;  %v2537_v60 = vrot.slane %v2536_v44, 1 }
 0x27b   : > { %v2538_v11 = vadd.f32 %v2537_v60, %v2536_v44  ;;  %v4906_v2 = vmul.f32 0.00390625, %v2469_v21 }
 0x27d   : > { %v2540_v38 = vmul.f32 0.00390625, %v2538_v11  ;;  %v2541_v30 = vmul.f32 %v4906_v2, %v4906_v2  ;;  %v2544_v39 = vsub.f32 %v4746_v56, %v4906_v2  ;;  %v2545_v16 = vsub.f32 %v4750_v40, %v4906_v2 }
 0x27e   : > { %v2546_v17 = vsub.f32 %v4743_v63, %v4906_v2  ;;  %v2547_v28 = vsub.f32 %v4748_v25, %v4906_v2  ;;  %v2548_v27 = vsub.f32 %v4768_v55, %v4906_v2  ;;  %v2549_v3 = vsub.f32 %v4775_v54, %v4906_v2 }
 0x27f   : > { %v2542_v46 = vsub.f32 %v2540_v38, %v2541_v30  ;;  %v2550_v0 = vsub.f32 %v4766_v29, %v4906_v2  ;;  %v2551_v56 = vsub.f32 %v4773_v45, %v4906_v2  ;;  %v2552_v40 = vsub.f32 %v4788_v18, %v4906_v2 }
 0x280   : > { %v2553_v63 = vsub.f32 %v4795_v48, %v4906_v2  ;;  %v2554_v25 = vsub.f32 %v4786_v59, %v4906_v2  ;;  %v2555_v55 = vsub.f32 %v4793_v58, %v4906_v2  ;;  %v2556_v54 = vsub.f32 %v4808_v7, %v4906_v2 }
 0x281   : > { %v2543_v31 = vmax.f32 %v2542_v46, 0.0  ;;  %v2557_v29 = vsub.f32 %v4815_v41, %v4906_v2  ;;  %v2558_v45 = vsub.f32 %v4806_v47, %v4906_v2  ;;  %v2559_v18 = vsub.f32 %v4813_v35, %v4906_v2 }
 0x282   : > { %v2560_v48 = vsub.f32 %v4828_v43, %v4906_v2  ;;  %v2561_v59 = vsub.f32 %v4835_v49, %v4906_v2  ;;  %v2562_v58 = vsub.f32 %v4826_v9, %v4906_v2  ;;  %v2563_v7 = vsub.f32 %v4833_v50, %v4906_v2 }
 0x283   : > { %v2564_v41 = vsub.f32 %v4848_v14, %v4906_v2  ;;  %v2565_v47 = vsub.f32 %v4855_v32, %v4906_v2  ;;  %v2566_v35 = vsub.f32 %v4846_v37, %v4906_v2  ;;  %v2567_v43 = vsub.f32 %v4853_v34, %v4906_v2 }
 0x284   : > { %v2568_v49 = vsub.f32 %v4868_v15, %v4906_v2  ;;  %v2569_v9 = vsub.f32 %v4875_v1, %v4906_v2  ;;  %v2570_v50 = vsub.f32 %v4866_v52, %v4906_v2  ;;  %v2571_v14 = vsub.f32 %v4873_v23, %v4906_v2 }
 0x285   : > { %v2572_v32 = vsub.f32 %v4888_v62, %v4906_v2  ;;  %v2573_v37 = vsub.f32 %v4895_v6, %v4906_v2  ;;  %v2574_v34 = vsub.f32 %v4886_v20, %v4906_v2  ;;  %v2575_v15 = vsub.f32 %v4893_v42, %v4906_v2 }
 0x286   : > { %v2576_v10 = vadd.f32 1e-05, %v2543_v31 }
 0x288   : > { %3598 = vrsqrt.f32 %v2576_v10 }
 0x292   : > { %v3599_v1 = vpop.eup %3598 }
 0x293   : > { %v4974_v24 = vmul.f32 %v3599_v1, %v2544_v39  ;;  %v4976_v52 = vmul.f32 %v3599_v1, %v2545_v16  ;;  %v4978_v23 = vmul.f32 %v3599_v1, %v2546_v17  ;;  %v4980_v22 = vmul.f32 %v3599_v1, %v2547_v28 }
 0x294   : > { %v4982_v62 = vmul.f32 %v3599_v1, %v2548_v27  ;;  %v4984_v6 = vmul.f32 %v3599_v1, %v2549_v3  ;;  %v4986_v13 = vmul.f32 %v3599_v1, %v2550_v0  ;;  %v4988_v20 = vmul.f32 %v3599_v1, %v2551_v56 }
 0x295   : > { %v4990_v42 = vmul.f32 %v3599_v1, %v2552_v40  ;;  %v2587_v57 = vmul.f32 %v3599_v1, %v2553_v63  ;;  %v2588_v12 = vmul.f32 %v3599_v1, %v2554_v25  ;;  %v2589_v5 = vmul.f32 %v3599_v1, %v2555_v55 }
 0x296   : > { %v2590_v61 = vmul.f32 %v3599_v1, %v2556_v54  ;;  %v2591_v19 = vmul.f32 %v3599_v1, %v2557_v29  ;;  %v2592_v51 = vmul.f32 %v3599_v1, %v2558_v45  ;;  %v2593_v36 = vmul.f32 %v3599_v1, %v2559_v18 }
 0x297   : > { %v4992_v8 = vmul.f32 %v3599_v1, %v2560_v48  ;;  %v2595_v33 = vmul.f32 %v3599_v1, %v2561_v59  ;;  %v2596_v4 = vmul.f32 %v3599_v1, %v2562_v58  ;;  %v2597_v26 = vmul.f32 %v3599_v1, %v2563_v7 }
 0x298   : > { %v2598_v53 = vmul.f32 %v3599_v1, %v2564_v41  ;;  %v2599_v44 = vmul.f32 %v3599_v1, %v2565_v47  ;;  %v2600_v21 = vmul.f32 %v3599_v1, %v2566_v35  ;;  %v2601_v60 = vmul.f32 %v3599_v1, %v2567_v43 }
 0x299   : > { %v4994_v11 = vmul.f32 %v3599_v1, %v2568_v49  ;;  %v2603_v2 = vmul.f32 %v3599_v1, %v2569_v9  ;;  %v2604_v38 = vmul.f32 %v3599_v1, %v2570_v50  ;;  %v2605_v30 = vmul.f32 %v3599_v1, %v2571_v14 }
 0x29a   : > { %v2606_v39 = vmul.f32 %v3599_v1, %v2572_v32  ;;  %v2607_v16 = vmul.f32 %v3599_v1, %v2573_v37  ;;  %v2608_v17 = vmul.f32 %v3599_v1, %v2574_v34  ;;  %v2609_v28 = vmul.f32 %v3599_v1, %v2575_v15 }
 0x29b   : > { %v2610_v27 = vmax.f32 %v4974_v24, 0.0  ;;  %v2611_v3 = vmax.f32 %v4976_v52, 0.0  ;;  %v2612_v46 = vmax.f32 %v4978_v23, 0.0  ;;  %v2613_v0 = vmax.f32 %v4980_v22, 0.0 }
 0x29c   : > { %v2614_v56 = vmax.f32 %v4982_v62, 0.0  ;;  %v2615_v40 = vmax.f32 %v4984_v6, 0.0  ;;  %v2616_v63 = vmax.f32 %v4986_v13, 0.0  ;;  %v2617_v25 = vmax.f32 %v4988_v20, 0.0 }
 0x29d   : > { %v2618_v55 = vmax.f32 %v4990_v42, 0.0  ;;  %v2619_v54 = vmax.f32 %v2587_v57, 0.0  ;;  %v2620_v31 = vmax.f32 %v2588_v12, 0.0  ;;  %v2621_v29 = vmax.f32 %v2589_v5, 0.0 }
 0x29e   : > { %v2622_v45 = vmax.f32 %v2590_v61, 0.0  ;;  %v2623_v18 = vmax.f32 %v2591_v19, 0.0  ;;  %v2624_v48 = vmax.f32 %v2592_v51, 0.0  ;;  %v2625_v59 = vmax.f32 %v2593_v36, 0.0 }
 0x29f   : > { %v2626_v58 = vmax.f32 %v4992_v8, 0.0  ;;  %v2627_v7 = vmax.f32 %v2595_v33, 0.0  ;;  %v2628_v41 = vmax.f32 %v2596_v4, 0.0  ;;  %v2629_v47 = vmax.f32 %v2597_v26, 0.0 }
 0x2a0   : > { %v2630_v35 = vmax.f32 %v2598_v53, 0.0  ;;  %v2631_v43 = vmax.f32 %v2599_v44, 0.0  ;;  %v2632_v49 = vmax.f32 %v2600_v21, 0.0  ;;  %v2633_v9 = vmax.f32 %v2601_v60, 0.0 }
 0x2a1   : > { %v2634_v50 = vmax.f32 %v4994_v11, 0.0  ;;  %v2635_v14 = vmax.f32 %v2603_v2, 0.0  ;;  %v2636_v32 = vmax.f32 %v2604_v38, 0.0  ;;  %v2637_v37 = vmax.f32 %v2605_v30, 0.0 }
 0x2a2   : > { %v2638_v34 = vmax.f32 %v2606_v39, 0.0  ;;  %v2639_v15 = vmax.f32 %v2607_v16, 0.0  ;;  %v2640_v10 = vmax.f32 %v2608_v17, 0.0  ;;  %v2641_v1 = vmax.f32 %v2609_v28, 0.0 }
 0x2a3   : > { %v3265_v24 = vpack.c.bf16 %v2611_v3, %v2610_v27  ;;  %v3270_v52 = vpack.c.bf16 %v2613_v0, %v2612_v46  ;;  %v3275_v23 = vpack.c.bf16 %v2615_v40, %v2614_v56  ;;  %v3280_v22 = vpack.c.bf16 %v2617_v25, %v2616_v63 }
 0x2a4   : > { %v3285_v62 = vpack.c.bf16 %v2619_v54, %v2618_v55  ;;  %v3290_v6 = vpack.c.bf16 %v2621_v29, %v2620_v31  ;;  %v3295_v13 = vpack.c.bf16 %v2623_v18, %v2622_v45  ;;  %v3300_v20 = vpack.c.bf16 %v2625_v59, %v2624_v48 }
 0x2a5   : > { %3266 = vst [vmem:[%s5011_s6] sm:$0xff] %v3265_v24   ;;  %3342 = vst [vmem:[%s5011_s6 + $0x8] sm:$0xff] %v3270_v52   ;;  %v3305_v42 = vpack.c.bf16 %v2627_v7, %v2626_v58  ;;  %v3310_v57 = vpack.c.bf16 %v2629_v47, %v2628_v41  ;;  %v3315_v12 = vpack.c.bf16 %v2631_v43, %v2630_v35 }
 0x2a6   : > { %3343 = vst [vmem:[%s5011_s6 + $0x10] sm:$0xff] %v3275_v23   ;;  %3344 = vst [vmem:[%s5011_s6 + $0x18] sm:$0xff] %v3280_v22   ;;  %v3320_v5 = vpack.c.bf16 %v2633_v9, %v2632_v49  ;;  %v3325_v61 = vpack.c.bf16 %v2635_v14, %v2634_v50  ;;  %v3330_v19 = vpack.c.bf16 %v2637_v37, %v2636_v32 }
 0x2a7   : > { %3345 = vst [vmem:[%s5011_s6 + $0x20] sm:$0xff] %v3285_v62   ;;  %3346 = vst [vmem:[%s5011_s6 + $0x28] sm:$0xff] %v3290_v6   ;;  %v3335_v51 = vpack.c.bf16 %v2639_v15, %v2638_v34  ;;  %v3340_v36 = vpack.c.bf16 %v2641_v1, %v2640_v10 }
 0x2a8   : > { %3347 = vst [vmem:[%s5011_s6 + $0x30] sm:$0xff] %v3295_v13   ;;  %3348 = vst [vmem:[%s5011_s6 + $0x38] sm:$0xff] %v3300_v20  }
 0x2a9   : > { %3349 = vst [vmem:[%s5011_s6 + $0x40] sm:$0xff] %v3305_v42   ;;  %3350 = vst [vmem:[%s5011_s6 + $0x48] sm:$0xff] %v3310_v57  }
 0x2aa   : > { %3351 = vst [vmem:[%s5011_s6 + $0x50] sm:$0xff] %v3315_v12   ;;  %3352 = vst [vmem:[%s5011_s6 + $0x58] sm:$0xff] %v3320_v5  }
 0x2ab   : > { %3353 = vst [vmem:[%s5011_s6 + $0x60] sm:$0xff] %v3325_v61   ;;  %3354 = vst [vmem:[%s5011_s6 + $0x68] sm:$0xff] %v3330_v19  }
 0x2ac   : > { %3355 = vst [vmem:[%s5011_s6 + $0x70] sm:$0xff] %v3335_v51   ;;  %3356 = vst [vmem:[%s5011_s6 + $0x78] sm:$0xff] %v3340_v36  }
 0x2ad PF: > { %s12_s11 = sadd.s32 1, %s3622_s11   ;;  %s5041_s9 = smov %s3618_s10 }
 0x2ae   : > { %p9_p5 = scmp.ge.s32.totalorder %s12_s11, 4   ;;  %s5042_s10 = smov %s5044_s12 }
 0x2b0   :  { %11 = sbr.rel (!%p9_p5) target bundleno = 2 (0x2), region = 67 }

</bundles_post_ra>
